<compile_context>
chip_gen: v7x
topology: tpu7x:2x2x1
jax: 0.10.0
libtpu: 0.0.40
codegen_flags: <defaults>
</compile_context>

<pallas_src>
import functools

import jax
import jax.numpy as jnp
import numpy as np
from jax.experimental import pallas as pl
from jax.experimental.pallas import tpu as pltpu


# ----------------------------------------------------------------------------
# Fused kernel.  Activation layout: rows = oh*TB + b (h-major, batch-minor in
# sublanes), cols = ow*channels + c (w-major, c-minor).  The banded conv
# weights and the row-permuted fc1 weight consume this layout directly.
# ----------------------------------------------------------------------------
def _simplenet_kernel(x_ref, w1_ref, b1_ref, w2_ref, b2_ref,
                      fc1w_ref, fc1b_ref, fc2w_ref, fc2b_ref,
                      out_ref, y1_scr, y2_scr):
    in_h, tb, in_w = x_ref.shape             # (10, TB, 10)
    kh = w1_ref.shape[0]                     # 3   conv kernel height
    h1 = in_h - kh + 1                       # 8   conv1 output height
    h2 = h1 - kh + 1                         # 6   conv2 valid output height
    c1w = w1_ref.shape[2]                    # 256 = 8*32
    c2w = w2_ref.shape[1]                    # 384 = 6*64

    # ---- conv1: 3 banded GEMMs, batch folded into M (rows = oh*TB + b) ----
    acc1 = b1_ref[...]                                       # (1, 256) f32
    for ki in range(kh):
        lhs = x_ref[ki:ki + h1, :, :].reshape(h1 * tb, in_w)
        acc1 = acc1 + jnp.dot(lhs.astype(jnp.bfloat16), w1_ref[ki],
                              preferred_element_type=jnp.float32)

    # Park conv1 output in VMEM with kh-1 zero rows appended so conv2 can use
    # full 8-row windows (its last 2 output rows are junk, never read by fc1).
    y1_scr[:h1, :, :] = acc1.reshape(h1, tb, c1w)
    y1_scr[h1:, :, :] = jnp.zeros((kh - 1, tb, c1w), jnp.float32)

    # ---- conv2: one fused-K GEMM (K = 3*256 = 768), M = 8*TB --------------
    lhs2 = jnp.concatenate(
        [y1_scr[ki:ki + h1, :, :].reshape(h1 * tb, c1w) for ki in range(kh)],
        axis=1)                                              # (8*TB, 768) f32
    y2 = jnp.dot(lhs2.astype(jnp.bfloat16), w2_ref[...],
                 preferred_element_type=jnp.float32) + b2_ref[...]
    y2_scr[...] = y2.reshape(h1, tb, c2w)                    # rows 6,7 junk

    # ---- fc1: 6 GEMMs with M = TB against the row-permuted (K, N) weight --
    hid = fc1b_ref[...]                                      # (1, 128) f32
    for r in range(h2):
        hid = hid + jnp.dot(y2_scr[r].astype(jnp.bfloat16),
                            fc1w_ref[r * c2w:(r + 1) * c2w, :],
                            preferred_element_type=jnp.float32)

    # ---- fc2 into a lane-dense 128-wide slab (cols >= 10 carry 0 weights) --
    out_ref[...] = jnp.dot(hid.astype(jnp.bfloat16), fc2w_ref[...],
                           preferred_element_type=jnp.float32) + fc2b_ref[...]


# ----------------------------------------------------------------------------
# Init-time layout plumbing (runs once, outside the hot path).
# ----------------------------------------------------------------------------
def _banded_conv_weight(w_oihw, in_w):
    """Re-express a kh x kw 'valid' conv as kh banded GEMM weights.

    Returns B with shape (kh, in_w*c_in, out_w*c_out) such that
        out[oh, ow*c_out+co] = sum_ki  X[oh+ki, :] @ B[ki]
    where X rows are laid out as col = w*c_in + ci (w-major, channel-minor).
    """
    w = np.asarray(w_oihw)                   # (c_out, c_in, kh, kw) torch layout
    c_out, c_in, kh, kw = w.shape
    out_w = in_w - kw + 1
    b = np.zeros((kh, in_w * c_in, out_w * c_out), np.float32)
    for ki in range(kh):
        for ow in range(out_w):
            for kj in range(kw):
                b[ki,
                  (ow + kj) * c_in:(ow + kj + 1) * c_in,
                  ow * c_out:(ow + 1) * c_out] = w[:, :, ki, kj].T
    return jnp.asarray(b)


def init_params():
    """Deterministic torch-layout parameters (shapes from SimpleNet)."""
    keys = jax.random.split(jax.random.PRNGKey(42), 8)
    return {
        "conv1_w": 0.1 * jax.random.normal(keys[0], (32, 1, 3, 3), jnp.float32),
        "conv1_b": 0.1 * jax.random.normal(keys[1], (32,), jnp.float32),
        "conv2_w": 0.05 * jax.random.normal(keys[2], (64, 32, 3, 3), jnp.float32),
        "conv2_b": 0.05 * jax.random.normal(keys[3], (64,), jnp.float32),
        "fc1_w": 0.02 * jax.random.normal(keys[4], (128, 64 * 6 * 6), jnp.float32),
        "fc1_b": 0.02 * jax.random.normal(keys[5], (128,), jnp.float32),
        "fc2_w": 0.1 * jax.random.normal(keys[6], (10, 128), jnp.float32),
        "fc2_b": 0.1 * jax.random.normal(keys[7], (10,), jnp.float32),
    }


def prepare_params(p):
    """One-time weight relayout + bf16 cast so the kernel does zero relayouts."""
    w1b = _banded_conv_weight(p["conv1_w"], in_w=10)           # (3, 10, 256)
    w2b = _banded_conv_weight(p["conv2_w"], in_w=8)            # (3, 256, 384)
    w2b = w2b.reshape(3 * 256, 6 * 64)                         # fused-K (768, 384)
    b1t = jnp.tile(p["conv1_b"], 8).reshape(1, 8 * 32)         # col = ow*32+c
    b2t = jnp.tile(p["conv2_b"], 6).reshape(1, 6 * 64)         # col = ow*64+c
    # fc1: torch flattens NCHW (c, h, w); permute the input dim to the
    # kernel's (h, w, c) activation layout and store as (K, N).
    fc1w = p["fc1_w"].reshape(128, 64, 6, 6)                   # (f, c, h, w)
    fc1w = jnp.transpose(fc1w, (2, 3, 1, 0)).reshape(6 * 6 * 64, 128)
    fc1b = p["fc1_b"].reshape(1, 128)
    # fc2: (K, N) layout, padded N 10 -> 128 for a lane-dense output slab.
    fc2w = jnp.zeros((128, 128), jnp.float32).at[:, :10].set(p["fc2_w"].T)
    fc2b = jnp.zeros((1, 128), jnp.float32).at[:, :10].set(p["fc2_b"])
    return dict(w1b=w1b.astype(jnp.bfloat16), b1t=b1t,
                w2b=w2b.astype(jnp.bfloat16), b2t=b2t,
                fc1w=fc1w.astype(jnp.bfloat16), fc1b=fc1b,
                fc2w=fc2w.astype(jnp.bfloat16), fc2b=fc2b)


# ----------------------------------------------------------------------------
# Forward pass (input NCHW like PyTorch), single pallas_call with a batch grid.
# ----------------------------------------------------------------------------
@functools.partial(jax.jit, static_argnames=("tb",))
def simplenet_forward(prep, x_nchw, tb=8):
    assert tb % 8 == 0
    n, _, h, w = x_nchw.shape
    x3d = x_nchw.reshape(n, h, w)                 # c_in == 1: NCHW -> (N, H, W)
    n_pad = ((n + tb - 1) // tb) * tb
    if n_pad != n:
        x3d = jnp.pad(x3d, ((0, n_pad - n), (0, 0), (0, 0)))
    # Layout plumbing (outside the kernel): (N, H, W) -> (H, N, W) so every
    # in-kernel slice is leading-dim and every reshape is tile-aligned.
    x_t = jnp.transpose(x3d, (1, 0, 2))           # (10, N_pad, 10)

    args = (x_t, prep["w1b"], prep["b1t"], prep["w2b"], prep["b2t"],
            prep["fc1w"], prep["fc1b"], prep["fc2w"], prep["fc2b"])

    def pinned(a):                                # weights: resident block 0
        return pl.BlockSpec(a.shape, lambda i, nd=a.ndim: (0,) * nd)

    grid = (n_pad // tb,)
    flops = 2 * n_pad * (3 * 8 * 10 * 256 + 8 * 768 * 384
                         + 6 * 384 * 128 + 128 * 128)
    bytes_accessed = (sum(int(a.size) * a.dtype.itemsize for a in args[1:])
                      + int(x_t.size) * 4 + n_pad * 128 * 4)

    out = pl.pallas_call(
        _simplenet_kernel,
        out_shape=jax.ShapeDtypeStruct((n_pad, 128), jnp.float32),
        grid=grid,
        in_specs=[pl.BlockSpec((h, tb, w), lambda i: (0, i, 0))]
                 + [pinned(a) for a in args[1:]],
        out_specs=pl.BlockSpec((tb, 128), lambda i: (i, 0)),
        scratch_shapes=[pltpu.VMEM((h, tb, 8 * 32), jnp.float32),   # conv1 out
                        pltpu.VMEM((8, tb, 6 * 64), jnp.float32)],  # conv2 out
        compiler_params=pltpu.CompilerParams(
            dimension_semantics=("parallel",)),
        cost_estimate=pl.CostEstimate(flops=flops, transcendentals=0,
                                      bytes_accessed=bytes_accessed),
    )(*args)
    return out[:n, :10]                           # drop batch / lane padding


# ----------------------------------------------------------------------------
# Pure-JAX reference (high precision) for a correctness sanity check.
# ----------------------------------------------------------------------------
def reference_forward(p, x_nchw):
    hp = jax.lax.Precision.HIGHEST
    y = jax.lax.conv_general_dilated(
        x_nchw, p["conv1_w"], (1, 1), "VALID",
        dimension_numbers=("NCHW", "OIHW", "NCHW"), precision=hp)
    y = y + p["conv1_b"][None, :, None, None]
    y = jax.lax.conv_general_dilated(
        y, p["conv2_w"], (1, 1), "VALID",
        dimension_numbers=("NCHW", "OIHW", "NCHW"), precision=hp)
    y = y + p["conv2_b"][None, :, None, None]
    f = y.reshape(y.shape[0], 64 * 6 * 6)
    h = jnp.dot(f, p["fc1_w"].T, precision=hp) + p["fc1_b"]
    return jnp.dot(h, p["fc2_w"].T, precision=hp) + p["fc2_b"]


if __name__ == "__main__":
    params = init_params()
    prep = prepare_params(params)
    # Spatial size implied by the module: 10x10 -> 8x8 -> 6x6 -> 64*6*6.
    x = jax.random.normal(jax.random.PRNGKey(0), (2, 1, 10, 10), jnp.float32)
    out = simplenet_forward(prep, x)
    jax.block_until_ready(out)
    assert out.shape == (2, 10), out.shape
    ref = reference_forward(params, x)
    max_err = float(jnp.max(jnp.abs(out - ref)))
    assert jnp.allclose(out, ref, rtol=3e-2, atol=3e-2), max_err
    print("KERNEL_OK")
</pallas_src>

<mosaic_0001>
module attributes {stable_mosaic.version = 11 : i64} {
  func.func @_simplenet_kernel(%arg0: i32, %arg1: memref<10x8x10xf32, #tpu.memory_space<vmem>>, %arg2: memref<3x10x256xbf16, #tpu.memory_space<vmem>>, %arg3: memref<1x256xf32, #tpu.memory_space<vmem>>, %arg4: memref<768x384xbf16, #tpu.memory_space<vmem>>, %arg5: memref<1x384xf32, #tpu.memory_space<vmem>>, %arg6: memref<2304x128xbf16, #tpu.memory_space<vmem>>, %arg7: memref<1x128xf32, #tpu.memory_space<vmem>>, %arg8: memref<128x128xbf16, #tpu.memory_space<vmem>>, %arg9: memref<1x128xf32, #tpu.memory_space<vmem>>, %arg10: memref<8x128xf32, #tpu.memory_space<vmem>>, %arg11: memref<10x8x256xf32, #tpu.memory_space<vmem>>, %arg12: memref<8x8x384xf32, #tpu.memory_space<vmem>>) attributes {dimension_semantics = [#tpu.dimension_semantics<parallel>], iteration_bounds = array<i64: 1>, scalar_prefetch = 0 : i64, scratch_operands = 2 : i64, tpu.core_type = #tpu.core_type<tc>, window_params = [{transform_indices = @transform_0, window_bounds = array<i64: 10, 8, 10>}, {pipeline_mode = #tpu.pipeline_mode<synchronous>, transform_indices = @transform_1, window_bounds = array<i64: 3, 10, 256>}, {pipeline_mode = #tpu.pipeline_mode<synchronous>, transform_indices = @transform_2, window_bounds = array<i64: 1, 256>}, {pipeline_mode = #tpu.pipeline_mode<synchronous>, transform_indices = @transform_3, window_bounds = array<i64: 768, 384>}, {pipeline_mode = #tpu.pipeline_mode<synchronous>, transform_indices = @transform_4, window_bounds = array<i64: 1, 384>}, {pipeline_mode = #tpu.pipeline_mode<synchronous>, transform_indices = @transform_5, window_bounds = array<i64: 2304, 128>}, {pipeline_mode = #tpu.pipeline_mode<synchronous>, transform_indices = @transform_6, window_bounds = array<i64: 1, 128>}, {pipeline_mode = #tpu.pipeline_mode<synchronous>, transform_indices = @transform_7, window_bounds = array<i64: 128, 128>}, {pipeline_mode = #tpu.pipeline_mode<synchronous>, transform_indices = @transform_8, window_bounds = array<i64: 1, 128>}, {transform_indices = @transform_9, window_bounds = array<i64: 8, 128>}]} {
    %c0 = arith.constant 0 : index
    %c0_0 = arith.constant 0 : index
    %0 = vector.load %arg3[%c0, %c0_0] : memref<1x256xf32, #tpu.memory_space<vmem>>, vector<1x256xf32>
    %c0_1 = arith.constant 0 : index
    %c0_2 = arith.constant 0 : index
    %c0_3 = arith.constant 0 : index
    %1 = vector.load %arg1[%c0_1, %c0_2, %c0_3] : memref<10x8x10xf32, #tpu.memory_space<vmem>>, vector<8x8x10xf32>
    %2 = vector.shape_cast %1 : vector<8x8x10xf32> to vector<64x10xf32>
    %3 = arith.truncf %2 : vector<64x10xf32> to vector<64x10xbf16>
    %c0_4 = arith.constant 0 : index
    %c0_5 = arith.constant 0 : index
    %c0_6 = arith.constant 0 : index
    %4 = vector.load %arg2[%c0_4, %c0_5, %c0_6] : memref<3x10x256xbf16, #tpu.memory_space<vmem>>, vector<1x10x256xbf16>
    %5 = vector.shape_cast %4 : vector<1x10x256xbf16> to vector<10x256xbf16>
    %cst = arith.constant dense<0.000000e+00> : vector<64x256xf32>
    %6 = tpu.matmul %3, %5, %cst {dimension_numbers = #tpu.dot_dimension_numbers<[1], [0], [0], [1], [0, 0, 1, 1], [], []>} : vector<64x10xbf16>, vector<10x256xbf16>, vector<64x256xf32> -> vector<64x256xf32>
    %7 = vector.broadcast %0 : vector<1x256xf32> to vector<64x256xf32>
    %8 = arith.addf %7, %6 : vector<64x256xf32>
    %c1 = arith.constant 1 : index
    %c0_7 = arith.constant 0 : index
    %c0_8 = arith.constant 0 : index
    %9 = vector.load %arg1[%c1, %c0_7, %c0_8] : memref<10x8x10xf32, #tpu.memory_space<vmem>>, vector<8x8x10xf32>
    %10 = vector.shape_cast %9 : vector<8x8x10xf32> to vector<64x10xf32>
    %11 = arith.truncf %10 : vector<64x10xf32> to vector<64x10xbf16>
    %c1_9 = arith.constant 1 : index
    %c0_10 = arith.constant 0 : index
    %c0_11 = arith.constant 0 : index
    %12 = vector.load %arg2[%c1_9, %c0_10, %c0_11] : memref<3x10x256xbf16, #tpu.memory_space<vmem>>, vector<1x10x256xbf16>
    %13 = vector.shape_cast %12 : vector<1x10x256xbf16> to vector<10x256xbf16>
    %cst_12 = arith.constant dense<0.000000e+00> : vector<64x256xf32>
    %14 = tpu.matmul %11, %13, %cst_12 {dimension_numbers = #tpu.dot_dimension_numbers<[1], [0], [0], [1], [0, 0, 1, 1], [], []>} : vector<64x10xbf16>, vector<10x256xbf16>, vector<64x256xf32> -> vector<64x256xf32>
    %15 = arith.addf %8, %14 : vector<64x256xf32>
    %c2 = arith.constant 2 : index
    %c0_13 = arith.constant 0 : index
    %c0_14 = arith.constant 0 : index
    %16 = vector.load %arg1[%c2, %c0_13, %c0_14] : memref<10x8x10xf32, #tpu.memory_space<vmem>>, vector<8x8x10xf32>
    %17 = vector.shape_cast %16 : vector<8x8x10xf32> to vector<64x10xf32>
    %18 = arith.truncf %17 : vector<64x10xf32> to vector<64x10xbf16>
    %c2_15 = arith.constant 2 : index
    %c0_16 = arith.constant 0 : index
    %c0_17 = arith.constant 0 : index
    %19 = vector.load %arg2[%c2_15, %c0_16, %c0_17] : memref<3x10x256xbf16, #tpu.memory_space<vmem>>, vector<1x10x256xbf16>
    %20 = vector.shape_cast %19 : vector<1x10x256xbf16> to vector<10x256xbf16>
    %cst_18 = arith.constant dense<0.000000e+00> : vector<64x256xf32>
    %21 = tpu.matmul %18, %20, %cst_18 {dimension_numbers = #tpu.dot_dimension_numbers<[1], [0], [0], [1], [0, 0, 1, 1], [], []>} : vector<64x10xbf16>, vector<10x256xbf16>, vector<64x256xf32> -> vector<64x256xf32>
    %22 = arith.addf %15, %21 : vector<64x256xf32>
    %23 = vector.shape_cast %22 : vector<64x256xf32> to vector<8x8x256xf32>
    %c0_19 = arith.constant 0 : index
    %c0_20 = arith.constant 0 : index
    %c0_21 = arith.constant 0 : index
    %24 = vector.load %arg11[%c0_19, %c0_20, %c0_21] : memref<10x8x256xf32, #tpu.memory_space<vmem>>, vector<8x8x256xf32>
    tpu.vector_store %arg11[%c0_19, %c0_20, %c0_21], %23 {strides = array<i32>} : memref<10x8x256xf32, #tpu.memory_space<vmem>>, vector<8x8x256xf32>,
    %cst_22 = arith.constant 0.000000e+00 : f32
    %25 = vector.broadcast %cst_22 : f32 to vector<2x8x256xf32>
    %c8 = arith.constant 8 : index
    %c0_23 = arith.constant 0 : index
    %c0_24 = arith.constant 0 : index
    %26 = vector.load %arg11[%c8, %c0_23, %c0_24] : memref<10x8x256xf32, #tpu.memory_space<vmem>>, vector<2x8x256xf32>
    tpu.vector_store %arg11[%c8, %c0_23, %c0_24], %25 {strides = array<i32>} : memref<10x8x256xf32, #tpu.memory_space<vmem>>, vector<2x8x256xf32>,
    %c0_25 = arith.constant 0 : index
    %c0_26 = arith.constant 0 : index
    %c0_27 = arith.constant 0 : index
    %27 = vector.load %arg11[%c0_25, %c0_26, %c0_27] : memref<10x8x256xf32, #tpu.memory_space<vmem>>, vector<8x8x256xf32>
    %28 = vector.shape_cast %27 : vector<8x8x256xf32> to vector<64x256xf32>
    %c1_28 = arith.constant 1 : index
    %c0_29 = arith.constant 0 : index
    %c0_30 = arith.constant 0 : index
    %29 = vector.load %arg11[%c1_28, %c0_29, %c0_30] : memref<10x8x256xf32, #tpu.memory_space<vmem>>, vector<8x8x256xf32>
    %30 = vector.shape_cast %29 : vector<8x8x256xf32> to vector<64x256xf32>
    %c2_31 = arith.constant 2 : index
    %c0_32 = arith.constant 0 : index
    %c0_33 = arith.constant 0 : index
    %31 = vector.load %arg11[%c2_31, %c0_32, %c0_33] : memref<10x8x256xf32, #tpu.memory_space<vmem>>, vector<8x8x256xf32>
    %32 = vector.shape_cast %31 : vector<8x8x256xf32> to vector<64x256xf32>
    %33 = tpu.concatenate %28, %30, %32 in 1 : vector<64x256xf32>, vector<64x256xf32>, vector<64x256xf32> -> vector<64x768xf32>
    %34 = arith.truncf %33 : vector<64x768xf32> to vector<64x768xbf16>
    %c0_34 = arith.constant 0 : index
    %c0_35 = arith.constant 0 : index
    %35 = vector.load %arg4[%c0_34, %c0_35] : memref<768x384xbf16, #tpu.memory_space<vmem>>, vector<768x384xbf16>
    %cst_36 = arith.constant dense<0.000000e+00> : vector<64x384xf32>
    %36 = tpu.matmul %34, %35, %cst_36 {dimension_numbers = #tpu.dot_dimension_numbers<[1], [0], [0], [1], [0, 0, 1, 1], [], []>} : vector<64x768xbf16>, vector<768x384xbf16>, vector<64x384xf32> -> vector<64x384xf32>
    %c0_37 = arith.constant 0 : index
    %c0_38 = arith.constant 0 : index
    %37 = vector.load %arg5[%c0_37, %c0_38] : memref<1x384xf32, #tpu.memory_space<vmem>>, vector<1x384xf32>
    %38 = vector.broadcast %37 : vector<1x384xf32> to vector<64x384xf32>
    %39 = arith.addf %36, %38 : vector<64x384xf32>
    %40 = vector.shape_cast %39 : vector<64x384xf32> to vector<8x8x384xf32>
    %c0_39 = arith.constant 0 : index
    %c0_40 = arith.constant 0 : index
    %c0_41 = arith.constant 0 : index
    %41 = vector.load %arg12[%c0_39, %c0_40, %c0_41] : memref<8x8x384xf32, #tpu.memory_space<vmem>>, vector<8x8x384xf32>
    tpu.vector_store %arg12[%c0_39, %c0_40, %c0_41], %40 {strides = array<i32>} : memref<8x8x384xf32, #tpu.memory_space<vmem>>, vector<8x8x384xf32>,
    %c0_42 = arith.constant 0 : index
    %c0_43 = arith.constant 0 : index
    %42 = vector.load %arg7[%c0_42, %c0_43] : memref<1x128xf32, #tpu.memory_space<vmem>>, vector<1x128xf32>
    %c0_44 = arith.constant 0 : index
    %c0_45 = arith.constant 0 : index
    %c0_46 = arith.constant 0 : index
    %43 = vector.load %arg12[%c0_44, %c0_45, %c0_46] : memref<8x8x384xf32, #tpu.memory_space<vmem>>, vector<1x8x384xf32>
    %44 = vector.shape_cast %43 : vector<1x8x384xf32> to vector<8x384xf32>
    %45 = arith.truncf %44 : vector<8x384xf32> to vector<8x384xbf16>
    %c0_47 = arith.constant 0 : index
    %c0_48 = arith.constant 0 : index
    %46 = vector.load %arg6[%c0_47, %c0_48] : memref<2304x128xbf16, #tpu.memory_space<vmem>>, vector<384x128xbf16>
    %cst_49 = arith.constant dense<0.000000e+00> : vector<8x128xf32>
    %47 = tpu.matmul %45, %46, %cst_49 {dimension_numbers = #tpu.dot_dimension_numbers<[1], [0], [0], [1], [0, 0, 1, 1], [], []>} : vector<8x384xbf16>, vector<384x128xbf16>, vector<8x128xf32> -> vector<8x128xf32>
    %48 = vector.broadcast %42 : vector<1x128xf32> to vector<8x128xf32>
    %49 = arith.addf %48, %47 : vector<8x128xf32>
    %c1_50 = arith.constant 1 : index
    %c0_51 = arith.constant 0 : index
    %c0_52 = arith.constant 0 : index
    %50 = vector.load %arg12[%c1_50, %c0_51, %c0_52] : memref<8x8x384xf32, #tpu.memory_space<vmem>>, vector<1x8x384xf32>
    %51 = vector.shape_cast %50 : vector<1x8x384xf32> to vector<8x384xf32>
    %52 = arith.truncf %51 : vector<8x384xf32> to vector<8x384xbf16>
    %c384 = arith.constant 384 : index
    %c0_53 = arith.constant 0 : index
    %53 = vector.load %arg6[%c384, %c0_53] : memref<2304x128xbf16, #tpu.memory_space<vmem>>, vector<384x128xbf16>
    %cst_54 = arith.constant dense<0.000000e+00> : vector<8x128xf32>
    %54 = tpu.matmul %52, %53, %cst_54 {dimension_numbers = #tpu.dot_dimension_numbers<[1], [0], [0], [1], [0, 0, 1, 1], [], []>} : vector<8x384xbf16>, vector<384x128xbf16>, vector<8x128xf32> -> vector<8x128xf32>
    %55 = arith.addf %49, %54 : vector<8x128xf32>
    %c2_55 = arith.constant 2 : index
    %c0_56 = arith.constant 0 : index
    %c0_57 = arith.constant 0 : index
    %56 = vector.load %arg12[%c2_55, %c0_56, %c0_57] : memref<8x8x384xf32, #tpu.memory_space<vmem>>, vector<1x8x384xf32>
    %57 = vector.shape_cast %56 : vector<1x8x384xf32> to vector<8x384xf32>
    %58 = arith.truncf %57 : vector<8x384xf32> to vector<8x384xbf16>
    %c768 = arith.constant 768 : index
    %c0_58 = arith.constant 0 : index
    %59 = vector.load %arg6[%c768, %c0_58] : memref<2304x128xbf16, #tpu.memory_space<vmem>>, vector<384x128xbf16>
    %cst_59 = arith.constant dense<0.000000e+00> : vector<8x128xf32>
    %60 = tpu.matmul %58, %59, %cst_59 {dimension_numbers = #tpu.dot_dimension_numbers<[1], [0], [0], [1], [0, 0, 1, 1], [], []>} : vector<8x384xbf16>, vector<384x128xbf16>, vector<8x128xf32> -> vector<8x128xf32>
    %61 = arith.addf %55, %60 : vector<8x128xf32>
    %c3 = arith.constant 3 : index
    %c0_60 = arith.constant 0 : index
    %c0_61 = arith.constant 0 : index
    %62 = vector.load %arg12[%c3, %c0_60, %c0_61] : memref<8x8x384xf32, #tpu.memory_space<vmem>>, vector<1x8x384xf32>
    %63 = vector.shape_cast %62 : vector<1x8x384xf32> to vector<8x384xf32>
    %64 = arith.truncf %63 : vector<8x384xf32> to vector<8x384xbf16>
    %c1152 = arith.constant 1152 : index
    %c0_62 = arith.constant 0 : index
    %65 = vector.load %arg6[%c1152, %c0_62] : memref<2304x128xbf16, #tpu.memory_space<vmem>>, vector<384x128xbf16>
    %cst_63 = arith.constant dense<0.000000e+00> : vector<8x128xf32>
    %66 = tpu.matmul %64, %65, %cst_63 {dimension_numbers = #tpu.dot_dimension_numbers<[1], [0], [0], [1], [0, 0, 1, 1], [], []>} : vector<8x384xbf16>, vector<384x128xbf16>, vector<8x128xf32> -> vector<8x128xf32>
    %67 = arith.addf %61, %66 : vector<8x128xf32>
    %c4 = arith.constant 4 : index
    %c0_64 = arith.constant 0 : index
    %c0_65 = arith.constant 0 : index
    %68 = vector.load %arg12[%c4, %c0_64, %c0_65] : memref<8x8x384xf32, #tpu.memory_space<vmem>>, vector<1x8x384xf32>
    %69 = vector.shape_cast %68 : vector<1x8x384xf32> to vector<8x384xf32>
    %70 = arith.truncf %69 : vector<8x384xf32> to vector<8x384xbf16>
    %c1536 = arith.constant 1536 : index
    %c0_66 = arith.constant 0 : index
    %71 = vector.load %arg6[%c1536, %c0_66] : memref<2304x128xbf16, #tpu.memory_space<vmem>>, vector<384x128xbf16>
    %cst_67 = arith.constant dense<0.000000e+00> : vector<8x128xf32>
    %72 = tpu.matmul %70, %71, %cst_67 {dimension_numbers = #tpu.dot_dimension_numbers<[1], [0], [0], [1], [0, 0, 1, 1], [], []>} : vector<8x384xbf16>, vector<384x128xbf16>, vector<8x128xf32> -> vector<8x128xf32>
    %73 = arith.addf %67, %72 : vector<8x128xf32>
    %c5 = arith.constant 5 : index
    %c0_68 = arith.constant 0 : index
    %c0_69 = arith.constant 0 : index
    %74 = vector.load %arg12[%c5, %c0_68, %c0_69] : memref<8x8x384xf32, #tpu.memory_space<vmem>>, vector<1x8x384xf32>
    %75 = vector.shape_cast %74 : vector<1x8x384xf32> to vector<8x384xf32>
    %76 = arith.truncf %75 : vector<8x384xf32> to vector<8x384xbf16>
    %c1920 = arith.constant 1920 : index
    %c0_70 = arith.constant 0 : index
    %77 = vector.load %arg6[%c1920, %c0_70] : memref<2304x128xbf16, #tpu.memory_space<vmem>>, vector<384x128xbf16>
    %cst_71 = arith.constant dense<0.000000e+00> : vector<8x128xf32>
    %78 = tpu.matmul %76, %77, %cst_71 {dimension_numbers = #tpu.dot_dimension_numbers<[1], [0], [0], [1], [0, 0, 1, 1], [], []>} : vector<8x384xbf16>, vector<384x128xbf16>, vector<8x128xf32> -> vector<8x128xf32>
    %79 = arith.addf %73, %78 : vector<8x128xf32>
    %80 = arith.truncf %79 : vector<8x128xf32> to vector<8x128xbf16>
    %c0_72 = arith.constant 0 : index
    %c0_73 = arith.constant 0 : index
    %81 = vector.load %arg8[%c0_72, %c0_73] : memref<128x128xbf16, #tpu.memory_space<vmem>>, vector<128x128xbf16>
    %cst_74 = arith.constant dense<0.000000e+00> : vector<8x128xf32>
    %82 = tpu.matmul %80, %81, %cst_74 {dimension_numbers = #tpu.dot_dimension_numbers<[1], [0], [0], [1], [0, 0, 1, 1], [], []>} : vector<8x128xbf16>, vector<128x128xbf16>, vector<8x128xf32> -> vector<8x128xf32>
    %c0_75 = arith.constant 0 : index
    %c0_76 = arith.constant 0 : index
    %83 = vector.load %arg9[%c0_75, %c0_76] : memref<1x128xf32, #tpu.memory_space<vmem>>, vector<1x128xf32>
    %84 = vector.broadcast %83 : vector<1x128xf32> to vector<8x128xf32>
    %85 = arith.addf %82, %84 : vector<8x128xf32>
    %c0_77 = arith.constant 0 : index
    %c0_78 = arith.constant 0 : index
    %86 = vector.load %arg10[%c0_77, %c0_78] : memref<8x128xf32, #tpu.memory_space<vmem>>, vector<8x128xf32>
    tpu.vector_store %arg10[%c0_77, %c0_78], %85 {strides = array<i32>} : memref<8x128xf32, #tpu.memory_space<vmem>>, vector<8x128xf32>,
    return
  }
  func.func @transform_0(%arg0: i32) -> (i32, i32, i32) {
    %c0_i32 = arith.constant 0 : i32
    %c0_i32_0 = arith.constant 0 : i32
    %c0_i32_1 = arith.constant 0 : i32
    return %c0_i32, %arg0, %c0_i32_0 : i32, i32, i32
  }
  func.func @transform_1(%arg0: i32) -> (i32, i32, i32) {
    %c0_i32 = arith.constant 0 : i32
    %c0_i32_0 = arith.constant 0 : i32
    %c0_i32_1 = arith.constant 0 : i32
    %c0_i32_2 = arith.constant 0 : i32
    return %c0_i32, %c0_i32_0, %c0_i32_1 : i32, i32, i32
  }
  func.func @transform_2(%arg0: i32) -> (i32, i32) {
    %c0_i32 = arith.constant 0 : i32
    %c0_i32_0 = arith.constant 0 : i32
    %c0_i32_1 = arith.constant 0 : i32
    return %c0_i32, %c0_i32_0 : i32, i32
  }
  func.func @transform_3(%arg0: i32) -> (i32, i32) {
    %c0_i32 = arith.constant 0 : i32
    %c0_i32_0 = arith.constant 0 : i32
    %c0_i32_1 = arith.constant 0 : i32
    return %c0_i32, %c0_i32_0 : i32, i32
  }
  func.func @transform_4(%arg0: i32) -> (i32, i32) {
    %c0_i32 = arith.constant 0 : i32
    %c0_i32_0 = arith.constant 0 : i32
    %c0_i32_1 = arith.constant 0 : i32
    return %c0_i32, %c0_i32_0 : i32, i32
  }
  func.func @transform_5(%arg0: i32) -> (i32, i32) {
    %c0_i32 = arith.constant 0 : i32
    %c0_i32_0 = arith.constant 0 : i32
    %c0_i32_1 = arith.constant 0 : i32
    return %c0_i32, %c0_i32_0 : i32, i32
  }
  func.func @transform_6(%arg0: i32) -> (i32, i32) {
    %c0_i32 = arith.constant 0 : i32
    %c0_i32_0 = arith.constant 0 : i32
    %c0_i32_1 = arith.constant 0 : i32
    return %c0_i32, %c0_i32_0 : i32, i32
  }
  func.func @transform_7(%arg0: i32) -> (i32, i32) {
    %c0_i32 = arith.constant 0 : i32
    %c0_i32_0 = arith.constant 0 : i32
    %c0_i32_1 = arith.constant 0 : i32
    return %c0_i32, %c0_i32_0 : i32, i32
  }
  func.func @transform_8(%arg0: i32) -> (i32, i32) {
    %c0_i32 = arith.constant 0 : i32
    %c0_i32_0 = arith.constant 0 : i32
    %c0_i32_1 = arith.constant 0 : i32
    return %c0_i32, %c0_i32_0 : i32, i32
  }
  func.func @transform_9(%arg0: i32) -> (i32, i32) {
    %c0_i32 = arith.constant 0 : i32
    %c0_i32_0 = arith.constant 0 : i32
    return %arg0, %c0_i32 : i32, i32
  }
}

</mosaic_0001>

<bundles_post_ra>
// kernel: simplenet_forward.1
= control target key start
LH: loop header
LB: loop body
LE: loop exit
PB: predicated region body
PF: predicated region fallthrough
CT: control target
= control target key end

     0   :  { %14 = vsyncpa [#allocation5], 0  ;;  %s5566_s0 = inlined_call_operand.vmem [shape: f32[10,8,10], index: 0, kind: input, shape index: {}]   ;;  %s5567_s1 = inlined_call_operand.vmem [shape: bf16[3,10,256], index: 1, kind: input, shape index: {}]   ;;  %s5568_s2 = inlined_call_operand.vmem [shape: f32[1,256], index: 2, kind: input, shape index: {}]   ;;  %s5569_s3 = inlined_call_operand.hbm [shape: bf16[768,384], index: 3, kind: input, shape index: {}]   ;;  %s5570_s4 = inlined_call_operand.vmem [shape: f32[1,384], index: 4, kind: input, shape index: {}]   ;;  %s5571_s5 = inlined_call_operand.hbm [shape: bf16[2304,128], index: 5, kind: input, shape index: {}]   ;;  %s5572_s6 = inlined_call_operand.vmem [shape: f32[1,128], index: 6, kind: input, shape index: {}]   ;;  %s5573_s7 = inlined_call_operand.vmem [shape: bf16[128,128], index: 7, kind: input, shape index: {}]   ;;  %s5574_s8 = inlined_call_operand.vmem [shape: f32[1,128], index: 8, kind: input, shape index: {}]   ;;  %s5575_s9 = inlined_call_operand.vmem [shape: f32[8,128], index: 9, kind: output, shape index: {}]  }
   0x1   :  { %15 = vsyncpa [#allocation7], 0  ;;  %s5097_s30 = smov [#allocation4]   ;;  %s5049_s13 = scalar_lea.hbm %s5569_s3, 18432 }
   0x2   :  { %s27_s10 = sshll.u32 %s5097_s30, 4  ;;  %p5050_p0 = scmp.ne.s32.totalorder %s5569_s3, %s5049_s13  ;;  %s28_s10 = int_to_ptr.vmem [resolvable:$true] %s27_s10 }
   0x3   :  { %p5053_p1 = scmp.lt.u32.totalorder %s5049_s13, %s5569_s3 }
   0x5   :  { %p5055_p2 = pnand %p5053_p1, %p5050_p0 }
   0x7   :  { %5058 = shalt.err (!%p5055_p2)
}
   0x8   :  { %s5059_s18 = scalar_lea.vmem %s28_s10, 18432  ;;  %p5064_p4 = scmp.lt.s32.totalorder %s28_s10, %s28_s10 }
   0x9   :  { %p5060_p3 = scmp.ne.s32.totalorder %s28_s10, %s5059_s18  ;;  %p5065_p5 = scmp.lt.s32.totalorder %s5059_s18, %s5059_s18 }
   0xb   :  { %p5066_p6 = por %p5065_p5, %p5064_p4 }
   0xd   :  { %p5067_p7 = pnand %p5066_p6, %p5060_p3 }
   0xf   :  { %5070 = shalt.err (!%p5067_p7)
}
  0x10   :  { %s5098_s19 = smov 192   ;;  %s5099_s20 = smov 12  }
  0x11   :  { %33 = dma.hbm_to_vmem [thread:$0]  %s5569_s3, 18432, %s28_s10, [#allocation5], %s5098_s19, %s5098_s19, %s5099_s20  }
  0x12   :  { %s5100_s23 = smov [#allocation6]   ;;  %s5071_s27 = scalar_lea.hbm %s5571_s5, 18432 }
  0x13   :  { %s41_s24 = sshll.u32 %s5100_s23, 4  ;;  %p5072_p8 = scmp.ne.s32.totalorder %s5571_s5, %s5071_s27  ;;  %s42_s24 = int_to_ptr.vmem [resolvable:$true] %s41_s24 }
  0x14   :  { %p5075_p9 = scmp.lt.u32.totalorder %s5071_s27, %s5571_s5 }
  0x16   :  { %p5077_p10 = pnand %p5075_p9, %p5072_p8 }
  0x18   :  { %5080 = shalt.err (!%p5077_p10)
}
  0x19   :  { %s5081_s12 = scalar_lea.vmem %s42_s24, 18432  ;;  %p5086_p12 = scmp.lt.s32.totalorder %s42_s24, %s42_s24 }
  0x1a   :  { %p5082_p11 = scmp.ne.s32.totalorder %s42_s24, %s5081_s12  ;;  %p5087_p13 = scmp.lt.s32.totalorder %s5081_s12, %s5081_s12 }
  0x1c   :  { %p5088_p0 = por %p5087_p13, %p5086_p12 }
  0x1e   :  { %p5089_p1 = pnand %p5088_p0, %p5082_p11 }
  0x20   :  { %5092 = shalt.err (!%p5089_p1)
}
  0x21   :  { %s5101_s3 = smov 64   ;;  %s5102_s10 = smov 4  }
  0x22   :  { %47 = dma.hbm_to_vmem [thread:$0]  %s5571_s5, 18432, %s42_s24, [#allocation7], %s5101_s3, %s5101_s3, %s5102_s10  }
  0x23   :  { %5093 = dma.done.wait [#allocation5], 18432  }
  0x24   :  { %5094 = vsyncadd [#allocation5], 4294948864 }
  0x25   :  { %5095 = dma.done.wait [#allocation7], 18432  }
  0x26   :  { %5096 = vsyncadd [#allocation7], 4294948864  ;;  %v5103_v0 = vmov 0   ;;  %vm97_vm0 = vcmask 1044480   ;;  %v62_v3 = vld [vmem:[%s5566_s0] sm:$0xff]  ;;  %v5194_v4 = vld [vmem:[%s5566_s0 + $0x8] sm:$0xff] }
  0x27   :  { %136 = vmatprep.mubr.bf16.mxu0 %v5103_v0  ;;  %v4696_v1 = vld [vmem:[%s5567_s1 + $0x4] ss:$8 sps:$4 sm:$0x1f]   ;;  %v4698_v2 = vld [vmem:[%s5567_s1] ss:$8 sps:$4 sm:$0x1f]   ;;  %v70_v7 = vpack.c.bf16 %v5194_v4, %v62_v3 }
  0x28   :  { %3783 = vmatprep.subr.msk.bf16.mxu0 %vm97_vm0, %v4696_v1  ;;  %v4699_v5 = vld [vmem:[%s5567_s1 + $0x14] ss:$8 sps:$4 sm:$0x1f]   ;;  %v99_v6 = vsel %vm97_vm0, %v4698_v2, 0  ;;  %vm84_vm1 = vcmask 80896   ;;  %v66_v19 = vld [vmem:[%s5566_s0 + $0x20] sm:$0xff] }
  0x29   :  { %v4701_v8 = vld [vmem:[%s5567_s1 + $0x10] ss:$8 sps:$4 sm:$0x1f]   ;;  %105 = vmatpush1.bf16.msra.mxu0 %v99_v6  ;;  %v4702_v10 = vld [vmem:[%s5567_s1 + $0x24] ss:$8 sps:$4 sm:$0x1f]  }
  0x2a   :  { %3800 = vmatprep.subr.msk.bf16.mxu0 %vm97_vm0, %v4699_v5  ;;  %v241_v9 = vsel %vm97_vm0, %v4701_v8, 0  ;;  %v64_v11 = vld [vmem:[%s5566_s0 + $0x10] sm:$0xff]  ;;  %v5217_v12 = vld [vmem:[%s5566_s0 + $0x18] sm:$0xff]  ;;  %v4707_v14 = vld [vmem:[#allocation4] ss:$12 sps:$4 sm:$0xff]   ;;  %vm5106_vm2 = vmmov 0  }
  0x2b   :  { %v4705_v13 = vld [vmem:[#allocation4 + $0x4] ss:$12 sps:$4 sm:$0xff]   ;;  %v4708_v15 = vld [vmem:[#allocation4 + $0x1c] ss:$12 sps:$4 sm:$0xff]   ;;  %v5222_v16 = vpack.c.bf16 %v5217_v12, %v64_v11  ;;  %v4711_v18 = vld [vmem:[#allocation4 + $0x34] ss:$12 sps:$4 sm:$0xff]   ;;  %v213_v36 = vpack.c.bf16 %v64_v11, %v5194_v4  ;;  %v214_v45 = vpack.c.bf16 %v66_v19, %v5217_v12 }
  0x2c   :  { %3784 = vmatmul.mubr.msk.bf16.vlgmr.msra.gmra.mrb[0].mxu0 %vm84_vm1, %v70_v7  ;;  %1538 = vmatprep.subr.bf16.mxu1 %v4705_v13  ;;  %v4710_v17 = vld [vmem:[#allocation4 + $0x18] ss:$12 sps:$4 sm:$0xff]   ;;  %v4713_v20 = vld [vmem:[#allocation4 + $0x30] ss:$12 sps:$4 sm:$0xff]   ;;  %v5233_v21 = vld [vmem:[%s5566_s0 + $0x28] sm:$0xff] }
  0x2d   :  { %247 = vmatpush1.bf16.msra.mxu0 %v241_v9  ;;  %146 = vmatprep.mubr.bf16.mxu0 %v5103_v0  ;;  %v4714_v22 = vld [vmem:[#allocation4 + $0x4c] ss:$12 sps:$4 sm:$0xff]   ;;  %v5236_v23 = vpack.c.bf16 %v5233_v21, %v66_v19  ;;  %v4716_v24 = vld [vmem:[#allocation4 + $0x48] ss:$12 sps:$4 sm:$0xff]   ;;  %v4717_v25 = vld [vmem:[#allocation4 + $0x64] ss:$12 sps:$4 sm:$0xff]  }
  0x2e   :  { %3817 = vmatprep.subr.msk.bf16.mxu0 %vm97_vm0, %v4702_v10  ;;  %1539 = vmatpush1.bf16.msra.mxu1 %v4707_v14  ;;  %v68_v26 = vld [vmem:[%s5566_s0 + $0x30] sm:$0xff]  ;;  %v69_v27 = vld [vmem:[%s5566_s0 + $0x38] sm:$0xff]  ;;  %v4719_v28 = vld [vmem:[#allocation4 + $0x60] ss:$12 sps:$4 sm:$0xff]  }
  0x2f   :  { %1540 = vmatprep.subr.bf16.mxu1 %v4708_v15  ;;  %v4720_v29 = vld [vmem:[#allocation4 + $0x7c] ss:$12 sps:$4 sm:$0xff]   ;;  %v5247_v30 = vpack.c.bf16 %v69_v27, %v68_v26  ;;  %v4722_v31 = vld [vmem:[#allocation4 + $0x78] ss:$12 sps:$4 sm:$0xff]   ;;  %v4723_v32 = vld [vmem:[#allocation4 + $0x94] ss:$12 sps:$4 sm:$0xff]   ;;  %v215_v50 = vpack.c.bf16 %v68_v26, %v5233_v21  ;;  %v178_v15 = vlaneseq }
  0x30   :  { %v4704_v33 = vld [vmem:[%s5567_s1 + $0x20] ss:$8 sps:$4 sm:$0x1f]   ;;  %v4725_v34 = vld [vmem:[#allocation4 + $0x90] ss:$12 sps:$4 sm:$0xff]  }
  0x31   :  { %v4726_v35 = vld [vmem:[#allocation4 + $0xac] ss:$12 sps:$4 sm:$0xff]   ;;  %v372_v37 = vsel %vm97_vm0, %v4704_v33, 0  ;;  %v4728_v38 = vld [vmem:[#allocation4 + $0xa8] ss:$12 sps:$4 sm:$0xff]   ;;  %v3795_v52 = vld [vmem:[%s5566_s0 + $0x40] sm:$0xff] }
  0x32   :  { %1541 = vmatpush1.bf16.msra.mxu1 %v4710_v17  ;;  %v4729_v39 = vld [vmem:[#allocation4 + $0xc4] ss:$12 sps:$4 sm:$0xff]   ;;  %v4732_v40 = vld [vmem:[#allocation4 + $0xc8] ss:$12 sps:$4 sm:$0xff]   ;;  %v4731_v41 = vld [vmem:[#allocation4 + $0xc0] ss:$12 sps:$4 sm:$0xff]   ;;  %v216_v55 = vpack.c.bf16 %v3795_v52, %v69_v27 }
  0x33   :  { %1542 = vmatprep.subr.bf16.mxu1 %v4711_v18  ;;  %v4734_v42 = vld [vmem:[#allocation4 + $0xdc] ss:$12 sps:$4 sm:$0xff]   ;;  %v4736_v43 = vld [vmem:[#allocation4 + $0xd8] ss:$12 sps:$4 sm:$0xff]   ;;  %v4739_v44 = vld [vmem:[#allocation4 + $0xf4] ss:$12 sps:$4 sm:$0xff]  }
  0x34   :  { %3785 = vmatmul.mubr.msk.bf16.gmra.mrb[4].mxu0 %vm84_vm1, %v5222_v16  ;;  %v4741_v46 = vld [vmem:[#allocation4 + $0xf0] ss:$12 sps:$4 sm:$0xff]   ;;  %v4744_v47 = vld [vmem:[#allocation4 + $0x10c] ss:$12 sps:$4 sm:$0xff]   ;;  %v4746_v48 = vld [vmem:[#allocation4 + $0x108] ss:$12 sps:$4 sm:$0xff]  }
  0x35   :  { %156 = vmatprep.mubr.bf16.mxu0 %v5103_v0  ;;  %v4749_v49 = vld [vmem:[#allocation4 + $0x124] ss:$12 sps:$4 sm:$0xff]   ;;  %v4751_v51 = vld [vmem:[#allocation4 + $0x120] ss:$12 sps:$4 sm:$0xff]   ;;  %v4754_v53 = vld [vmem:[#allocation4 + $0x13c] ss:$12 sps:$4 sm:$0xff]  }
  0x36   :  { %1543 = vmatpush1.bf16.msra.mxu1 %v4713_v20  ;;  %v4756_v54 = vld [vmem:[#allocation4 + $0x138] ss:$12 sps:$4 sm:$0xff]   ;;  %v4733_v56 = vld [vmem:[#allocation4 + $0x8] ss:$12 sps:$4 sm:$0xff]   ;;  %v4737_v57 = vld [vmem:[#allocation4 + $0xe0] ss:$12 sps:$4 sm:$0xff]  }
  0x37   :  { %1544 = vmatprep.subr.bf16.mxu1 %v4714_v22  ;;  %v4738_v58 = vld [vmem:[#allocation4 + $0x20] ss:$12 sps:$4 sm:$0xff]   ;;  %v4742_v59 = vld [vmem:[#allocation4 + $0xf8] ss:$12 sps:$4 sm:$0xff]   ;;  %v4747_v61 = vld [vmem:[#allocation4 + $0x110] ss:$12 sps:$4 sm:$0xff]  }
  0x38   :  { %v4743_v60 = vld [vmem:[#allocation4 + $0x38] ss:$12 sps:$4 sm:$0xff]   ;;  %v4748_v62 = vld [vmem:[#allocation4 + $0x50] ss:$12 sps:$4 sm:$0xff]   ;;  %v4752_v63 = vld [vmem:[#allocation4 + $0x128] ss:$12 sps:$4 sm:$0xff]  }
  0x39   :  { %v4753_v1 = vld [vmem:[#allocation4 + $0x68] ss:$12 sps:$4 sm:$0xff]   ;;  %v4757_v2 = vld [vmem:[#allocation4 + $0x140] ss:$12 sps:$4 sm:$0xff]   ;;  %v4761_v7 = vld [vmem:[#allocation4 + $0x150] ss:$12 sps:$4 sm:$0xff]  }
  0x3a   :  { %1545 = vmatpush1.bf16.msra.mxu1 %v4716_v24  ;;  %v3812_v3 = vld [vmem:[%s5566_s0 + $0x48] sm:$0xff]  ;;  %v4759_v6 = vld [vmem:[#allocation4 + $0x154] ss:$12 sps:$4 sm:$0xff]   ;;  %v4762_v8 = vld [vmem:[#allocation4 + $0x158] ss:$12 sps:$4 sm:$0xff]  }
  0x3b   :  { %1546 = vmatprep.subr.bf16.mxu1 %v4717_v25  ;;  %v4758_v4 = vld [vmem:[#allocation4 + $0x80] ss:$12 sps:$4 sm:$0xff]   ;;  %v347_v5 = vpack.c.bf16 %v3812_v3, %v3795_v52  ;;  %v4763_v9 = vld [vmem:[#allocation4 + $0x98] ss:$12 sps:$4 sm:$0xff]   ;;  %v4766_v11 = vld [vmem:[#allocation4 + $0x168] ss:$12 sps:$4 sm:$0xff]  }
  0x3c   :  { %3786 = vmatmul.mubr.msk.bf16.gmra.mrb[8].mxu0 %vm84_vm1, %v5236_v23  ;;  %v4764_v10 = vld [vmem:[#allocation4 + $0x16c] ss:$12 sps:$4 sm:$0xff]   ;;  %v4767_v12 = vld [vmem:[#allocation4 + $0x170] ss:$12 sps:$4 sm:$0xff]   ;;  %v4772_v14 = vld [vmem:[#allocation4 + $0x248] ss:$12 sps:$4 sm:$0xff]  }
  0x3d   :  { %166 = vmatprep.mubr.bf16.mxu0 %v5103_v0  ;;  %v4768_v13 = vld [vmem:[#allocation4 + $0xb0] ss:$12 sps:$4 sm:$0xff]   ;;  %v61_v18 = vld [vmem:[%s5568_s2] sm:$0x3]  ;;  %v4773_v33 = vld [vmem:[#allocation4 + $0x188] ss:$12 sps:$4 sm:$0xff]  }
  0x3e   :  { %1547 = vmatpush1.bf16.msra.mxu1 %v4719_v28  ;;  %v4779_v52 = vld [vmem:[#allocation4 + $0x1b0] ss:$12 sps:$4 sm:$0xff]  }
  0x3f   :  { %1548 = vmatprep.subr.bf16.mxu1 %v4720_v29  ;;  %v4791_v3 = vld [vmem:[#allocation4 + $0x1e4] ss:$12 sps:$4 sm:$0xff]  }
  0x42   :  { %1549 = vmatpush1.bf16.msra.mxu1 %v4722_v31 }
  0x43   :  { %1550 = vmatprep.subr.bf16.mxu1 %v4723_v32  ;;  %v4769_v32 = vld [vmem:[#allocation4 + $0x180] ss:$12 sps:$4 sm:$0xff]  }
  0x44   :  { %3787 = vmatmul.mubr.msk.bf16.gmra.mrb[12].mxu0 %vm84_vm1, %v5247_v30 }
  0x45   :  { %278 = vmatprep.mubr.bf16.mxu0 %v5103_v0 }
  0x46   :  { %1551 = vmatpush1.bf16.msra.mxu1 %v4725_v34  ;;  %v4776_v34 = vld [vmem:[#allocation4 + $0x19c] ss:$12 sps:$4 sm:$0xff]  }
  0x47   :  { %1552 = vmatprep.subr.bf16.mxu1 %v4726_v35  ;;  %v4777_v35 = vld [vmem:[#allocation4 + $0x260] ss:$12 sps:$4 sm:$0xff]  }
  0x4a   :  { %1553 = vmatpush1.bf16.msra.mxu1 %v4728_v38 }
  0x4b   :  { %1554 = vmatprep.subr.bf16.mxu1 %v4729_v39 }
  0x4c   :  { %3801 = vmatmul.mubr.msk.bf16.vlgmr.msra.gmra.mrb[0].mxu0 %vm84_vm1, %v213_v36 }
  0x4d   :  { %378 = vmatpush1.bf16.msra.mxu0 %v372_v37  ;;  %288 = vmatprep.mubr.bf16.mxu0 %v5103_v0 }
  0x4e   :  { %4120 = vmatprep.subr.bf16.mxu0 %v4732_v40  ;;  %1555 = vmatpush1.bf16.msra.mxu1 %v4731_v41  ;;  %v4774_v41 = vld [vmem:[#allocation4 + $0x198] ss:$12 sps:$4 sm:$0xff]  }
  0x4f   :  { %1556 = vmatprep.subr.bf16.mxu1 %v4734_v42  ;;  %v4778_v42 = vld [vmem:[#allocation4 + $0x1a0] ss:$12 sps:$4 sm:$0xff]  }
  0x52   :  { %1557 = vmatpush1.bf16.msra.mxu1 %v4736_v43 }
  0x53   :  { %1558 = vmatprep.subr.bf16.mxu1 %v4739_v44 }
  0x54   :  { %3802 = vmatmul.mubr.msk.bf16.gmra.mrb[4].mxu0 %vm84_vm1, %v214_v45 }
  0x55   :  { %298 = vmatprep.mubr.bf16.mxu0 %v5103_v0 }
  0x56   :  { %1559 = vmatpush1.bf16.msra.mxu1 %v4741_v46  ;;  %v4781_v46 = vld [vmem:[#allocation4 + $0x1b4] ss:$12 sps:$4 sm:$0xff]  }
  0x57   :  { %1560 = vmatprep.subr.bf16.mxu1 %v4744_v47  ;;  %v4782_v47 = vld [vmem:[#allocation4 + $0x278] ss:$12 sps:$4 sm:$0xff]  }
  0x5a   :  { %1561 = vmatpush1.bf16.msra.mxu1 %v4746_v48 }
  0x5b   :  { %1562 = vmatprep.subr.bf16.mxu1 %v4749_v49 }
  0x5c   :  { %3803 = vmatmul.mubr.msk.bf16.gmra.mrb[8].mxu0 %vm84_vm1, %v215_v50 }
  0x5d   :  { %308 = vmatprep.mubr.bf16.mxu0 %v5103_v0 }
  0x5e   :  { %1563 = vmatpush1.bf16.msra.mxu1 %v4751_v51 }
  0x5f   :  { %1564 = vmatprep.subr.bf16.mxu1 %v4754_v53  ;;  %v4783_v53 = vld [vmem:[#allocation4 + $0x1b8] ss:$12 sps:$4 sm:$0xff]  }
  0x62   :  { %1565 = vmatpush1.bf16.msra.mxu1 %v4756_v54  ;;  %v4786_v54 = vld [vmem:[#allocation4 + $0x1cc] ss:$12 sps:$4 sm:$0xff]  }
  0x63   :  { %1566 = vmatprep.subr.bf16.mxu1 %v4759_v6 }
  0x64   :  { %3804 = vmatmul.mubr.msk.bf16.gmra.mrb[12].mxu0 %vm84_vm1, %v216_v55  ;;  %v4787_v55 = vld [vmem:[#allocation4 + $0x290] ss:$12 sps:$4 sm:$0xff]  }
  0x65   :  { %409 = vmatprep.mubr.bf16.mxu0 %v5103_v0 }
  0x66   :  { %1567 = vmatpush1.bf16.msra.mxu1 %v4761_v7 }
  0x67   :  { %1568 = vmatprep.subr.bf16.mxu1 %v4764_v10  ;;  %v4793_v10 = vld [vmem:[#allocation4 + $0x1e8] ss:$12 sps:$4 sm:$0xff]  }
  0x6a   :  { %1569 = vmatpush1.bf16.msra.mxu1 %v4766_v11  ;;  %v4796_v11 = vld [vmem:[#allocation4 + $0x1fc] ss:$12 sps:$4 sm:$0xff]  }
  0x6c   :  { %3818 = vmatmul.mubr.msk.bf16.vlgmr.msra.gmra.mrb[0].mxu0 %vm84_vm1, %v5222_v16  ;;  %v5283_v16 = vshrl.u32 %v178_v15, 7 }
  0x6d   :  { %419 = vmatprep.mubr.bf16.mxu0 %v5103_v0  ;;  %4121 = vmatpush3.bf16.msra.mxu0 %v4733_v56 }
  0x6e   :  { %4122 = vmatprep.subr.bf16.mxu0 %v4737_v57  ;;  %v180_v17 = vsub.s32 0, %v5283_v16  ;;  %v184_v19 = vsub.s32 1, %v5283_v16 }
  0x70   :  { %v5292_v20 = vrot.slane %v61_v18, %v180_v17  ;;  %v5296_v22 = vrot.slane %v61_v18, %v184_v19 }
  0x71   :  { %4123 = vmatpush3.bf16.msra.mxu0 %v4738_v58 }
  0x72   :  { %4124 = vmatprep.subr.bf16.mxu0 %v4742_v59 }
  0x74   :  { %3819 = vmatmul.mubr.msk.bf16.gmra.mrb[4].mxu0 %vm84_vm1, %v5236_v23 }
  0x75   :  { %429 = vmatprep.mubr.bf16.mxu0 %v5103_v0  ;;  %4125 = vmatpush3.bf16.msra.mxu0 %v4743_v60 }
  0x76   :  { %4126 = vmatprep.subr.bf16.mxu0 %v4747_v61  ;;  %v4784_v61 = vld [vmem:[#allocation4 + $0x1c8] ss:$12 sps:$4 sm:$0xff]  }
  0x79   :  { %4127 = vmatpush3.bf16.msra.mxu0 %v4748_v62  ;;  %v4788_v62 = vld [vmem:[#allocation4 + $0x1d0] ss:$12 sps:$4 sm:$0xff]  }
  0x7a   :  { %4128 = vmatprep.subr.bf16.mxu0 %v4752_v63 }
  0x7c   :  { %3820 = vmatmul.mubr.msk.bf16.gmra.mrb[8].mxu0 %vm84_vm1, %v5247_v30 }
  0x7d   :  { %439 = vmatprep.mubr.bf16.mxu0 %v5103_v0  ;;  %4129 = vmatpush3.bf16.msra.mxu0 %v4753_v1  ;;  %v4771_v0 = vld [vmem:[#allocation4 + $0x184] ss:$12 sps:$4 sm:$0xff]  }
  0x7e   :  { %4130 = vmatprep.subr.bf16.mxu0 %v4757_v2  ;;  %1611 = vmatprep.subr.bf16.mxu1 %v4771_v0 }
  0x81   :  { %4131 = vmatpush3.bf16.msra.mxu0 %v4758_v4  ;;  %v4792_v4 = vld [vmem:[#allocation4 + $0x2a8] ss:$12 sps:$4 sm:$0xff]  }
  0x82   :  { %4132 = vmatprep.subr.bf16.mxu0 %v4762_v8 }
  0x84   :  { %3821 = vmatmul.mubr.msk.bf16.gmra.mrb[12].mxu0 %vm84_vm1, %v347_v5 }
  0x85   :  { %4133 = vmatpush3.bf16.msra.mxu0 %v4763_v9  ;;  %v4789_v9 = vld [vmem:[#allocation4 + $0x1e0] ss:$12 sps:$4 sm:$0xff]  }
  0x86   :  { %4134 = vmatprep.subr.bf16.mxu0 %v4767_v12  ;;  %v4797_v12 = vld [vmem:[#allocation4 + $0x2c0] ss:$12 sps:$4 sm:$0xff]  }
  0x89   :  { %4135 = vmatpush3.bf16.msra.mxu0 %v4768_v13 }
  0x8a   :  { %4160 = vmatprep.subr.bf16.mxu0 %v4772_v14 }
 0x13f   :  { %v411_v21 = vpop.f32.mrb[0].mxu0 }
 0x140   :  { %v413_v23 = vpop.f32.mrb[1].mxu0  ;;  %v4575_v25 = vadd.f32 %v411_v21, %v5292_v20  ;;  %v4794_v21 = vld [vmem:[#allocation4 + $0x1f8] ss:$12 sps:$4 sm:$0xff]  }
 0x141   :  { %v415_v24 = vpop.f32.mrb[2].mxu0  ;;  %v4576_v28 = vadd.f32 %v413_v23, %v5296_v22  ;;  %v4798_v23 = vld [vmem:[#allocation4 + $0x200] ss:$12 sps:$4 sm:$0xff]  }
 0x142   :  { %v4577_v26 = vadd.f32 %v415_v24, %v5292_v20  ;;  %v417_v27 = vpop.f32.mrb[3].mxu0 }
 0x143   :  { %v4578_v29 = vadd.f32 %v417_v27, %v5296_v22  ;;  %v4801_v27 = vld [vmem:[#allocation4 + $0x214] ss:$12 sps:$4 sm:$0xff]  }
 0x144   :  { %v537_v30 = vpack.c.bf16 %v4577_v26, %v4575_v25 }
 0x145   :  { %v538_v31 = vpack.c.bf16 %v4578_v29, %v4576_v28  ;;  %v4802_v28 = vld [vmem:[#allocation4 + $0x2d8] ss:$12 sps:$4 sm:$0xff]  }
 0x147   :  { %v421_v36 = vpop.f32.mrb[4].mxu0  ;;  %1570 = vmatprep.mubr.bf16.mxu1 %v538_v31  ;;  %1789 = vmatprep.mubr.bf16.mxu0 %v538_v31 }
 0x148   :  { %v4579_v37 = vadd.f32 %v421_v36, %v5292_v20  ;;  %v423_v38 = vpop.f32.mrb[5].mxu0  ;;  %1571 = vmatmul.mubr.bf16.vlgmr.msra.gmra.mrb[0].mxu1 %v537_v30  ;;  %1790 = vmatmul.mubr.bf16.vlgmr.msra.gmra.mrb[16].mxu0 %v537_v30  ;;  %v4808_v36 = vld [vmem:[#allocation4 + $0x230] ss:$12 sps:$4 sm:$0xff]  }
 0x149   :  { %v4580_v39 = vadd.f32 %v423_v38, %v5296_v22  ;;  %1612 = vmatpush1.bf16.msra.mxu1 %v4769_v32  ;;  %v425_v40 = vpop.f32.mrb[6].mxu0  ;;  %4161 = vmatpush3.bf16.msra.mxu0 %v4773_v33  ;;  %v4803_v33 = vld [vmem:[#allocation4 + $0x218] ss:$12 sps:$4 sm:$0xff]   ;;  %v4812_v38 = vld [vmem:[#allocation4 + $0x3c8] ss:$12 sps:$4 sm:$0xff]  }
 0x14a   :  { %v5304_v43 = vpack.c.bf16 %v4579_v37, %v4577_v26  ;;  %v4581_v44 = vadd.f32 %v425_v40, %v5292_v20  ;;  %v427_v45 = vpop.f32.mrb[7].mxu0  ;;  %1613 = vmatprep.subr.bf16.mxu1 %v4776_v34  ;;  %4162 = vmatprep.subr.bf16.mxu0 %v4777_v35  ;;  %v4806_v34 = vld [vmem:[#allocation4 + $0x22c] ss:$12 sps:$4 sm:$0xff]   ;;  %v4807_v35 = vld [vmem:[#allocation4 + $0x2f0] ss:$12 sps:$4 sm:$0xff]  }
 0x14b   :  { %v5307_v48 = vpack.c.bf16 %v4580_v39, %v4578_v29  ;;  %v4582_v49 = vadd.f32 %v427_v45, %v5296_v22  ;;  %v4813_v40 = vld [vmem:[#allocation4 + $0x308] ss:$12 sps:$4 sm:$0xff]   ;;  %v4818_v45 = vld [vmem:[#allocation4 + $0x320] ss:$12 sps:$4 sm:$0xff]  }
 0x14c   :  { %v5310_v50 = vpack.c.bf16 %v4581_v44, %v4579_v37  ;;  %v4811_v37 = vld [vmem:[#allocation4 + $0x244] ss:$12 sps:$4 sm:$0xff]  }
 0x14d   :  { %v5312_v51 = vpack.c.bf16 %v4582_v49, %v4580_v39  ;;  %1614 = vmatpush1.bf16.msra.mxu1 %v4774_v41  ;;  %4163 = vmatpush3.bf16.msra.mxu0 %v4778_v42  ;;  %v4809_v39 = vld [vmem:[#allocation4 + $0x240] ss:$12 sps:$4 sm:$0xff]   ;;  %v4816_v41 = vld [vmem:[#allocation4 + $0x25c] ss:$12 sps:$4 sm:$0xff]  }
 0x14e   :  { %1615 = vmatprep.subr.bf16.mxu1 %v4781_v46  ;;  %4164 = vmatprep.subr.bf16.mxu0 %v4782_v47  ;;  %v4817_v42 = vld [vmem:[#allocation4 + $0x3e0] ss:$12 sps:$4 sm:$0xff]   ;;  %v4822_v47 = vld [vmem:[#allocation4 + $0x3f8] ss:$12 sps:$4 sm:$0xff]  }
 0x14f   :  { %v431_v56 = vpop.f32.mrb[8].mxu0  ;;  %1580 = vmatprep.mubr.bf16.mxu1 %v5312_v51  ;;  %1797 = vmatprep.mubr.bf16.mxu0 %v5312_v51  ;;  %v4821_v46 = vld [vmem:[#allocation4 + $0x274] ss:$12 sps:$4 sm:$0xff]  }
 0x150   :  { %v4583_v57 = vadd.f32 %v431_v56, %v5292_v20  ;;  %v433_v58 = vpop.f32.mrb[9].mxu0  ;;  %1581 = vmatmul.mubr.bf16.gmra.mrb[4].mxu1 %v5310_v50  ;;  %1798 = vmatmul.mubr.bf16.gmra.mrb[20].mxu0 %v5310_v50  ;;  %v4831_v56 = vld [vmem:[#allocation4 + $0x2a4] ss:$12 sps:$4 sm:$0xff]  }
 0x151   :  { %v4584_v59 = vadd.f32 %v433_v58, %v5296_v22  ;;  %1616 = vmatpush1.bf16.msra.mxu1 %v4779_v52  ;;  %v435_v60 = vpop.f32.mrb[10].mxu0  ;;  %4165 = vmatpush3.bf16.msra.mxu0 %v4783_v53  ;;  %v4826_v52 = vld [vmem:[#allocation4 + $0x28c] ss:$12 sps:$4 sm:$0xff]   ;;  %v4827_v53 = vld [vmem:[#allocation4 + $0x410] ss:$12 sps:$4 sm:$0xff]  }
 0x152   :  { %v5320_v63 = vpack.c.bf16 %v4583_v57, %v4581_v44  ;;  %v4585_v1 = vadd.f32 %v435_v60, %v5292_v20  ;;  %v437_v2 = vpop.f32.mrb[11].mxu0  ;;  %1617 = vmatprep.subr.bf16.mxu1 %v4786_v54  ;;  %4166 = vmatprep.subr.bf16.mxu0 %v4787_v55  ;;  %v4814_v44 = vld [vmem:[#allocation4 + $0x258] ss:$12 sps:$4 sm:$0xff]   ;;  %v4824_v54 = vld [vmem:[#allocation4 + $0x288] ss:$12 sps:$4 sm:$0xff]  }
 0x153   :  { %v5323_v5 = vpack.c.bf16 %v4584_v59, %v4582_v49  ;;  %v4586_v6 = vadd.f32 %v437_v2, %v5296_v22  ;;  %v4823_v49 = vld [vmem:[#allocation4 + $0x338] ss:$12 sps:$4 sm:$0xff]   ;;  %v4828_v55 = vld [vmem:[#allocation4 + $0x350] ss:$12 sps:$4 sm:$0xff]   ;;  %v4829_v58 = vld [vmem:[#allocation4 + $0x2a0] ss:$12 sps:$4 sm:$0xff]  }
 0x154   :  { %v5326_v7 = vpack.c.bf16 %v4585_v1, %v4583_v57  ;;  %v4832_v57 = vld [vmem:[#allocation4 + $0x428] ss:$12 sps:$4 sm:$0xff]   ;;  %v4834_v2 = vld [vmem:[#allocation4 + $0x2b8] ss:$12 sps:$4 sm:$0xff]  }
 0x155   :  { %v5328_v8 = vpack.c.bf16 %v4586_v6, %v4584_v59  ;;  %1618 = vmatpush1.bf16.msra.mxu1 %v4784_v61  ;;  %4167 = vmatpush3.bf16.msra.mxu0 %v4788_v62  ;;  %v4833_v59 = vld [vmem:[#allocation4 + $0x368] ss:$12 sps:$4 sm:$0xff]   ;;  %v4837_v61 = vld [vmem:[#allocation4 + $0x440] ss:$12 sps:$4 sm:$0xff]   ;;  %v5104_v62 = vmov 0.0  }
 0x156   :  { %1619 = vmatprep.subr.bf16.mxu1 %v4791_v3  ;;  %4168 = vmatprep.subr.bf16.mxu0 %v4792_v4  ;;  %v4836_v60 = vld [vmem:[#allocation4 + $0x2bc] ss:$12 sps:$4 sm:$0xff]   ;;  %v4838_v3 = vld [vmem:[#allocation4 + $0x380] ss:$12 sps:$4 sm:$0xff]  }
 0x157   :  { %v441_v13 = vpop.f32.mrb[12].mxu0  ;;  %1590 = vmatprep.mubr.bf16.mxu1 %v5328_v8  ;;  %1805 = vmatprep.mubr.bf16.mxu0 %v5328_v8  ;;  %v4841_v4 = vld [vmem:[#allocation4 + $0x2d4] ss:$12 sps:$4 sm:$0xff]  }
 0x158   :  { %v4587_v0 = vadd.f32 %v441_v13, %v5292_v20  ;;  %v443_v14 = vpop.f32.mrb[13].mxu0  ;;  %1591 = vmatmul.mubr.bf16.gmra.mrb[8].mxu1 %v5326_v7  ;;  %1806 = vmatmul.mubr.bf16.gmra.mrb[24].mxu0 %v5326_v7  ;;  %v4847_v13 = vld [vmem:[#allocation4 + $0x470] ss:$12 sps:$4 sm:$0xff]  }
 0x159   :  { %v4588_v15 = vadd.f32 %v443_v14, %v5296_v22  ;;  %1620 = vmatpush1.bf16.msra.mxu1 %v4789_v9  ;;  %v445_v18 = vpop.f32.mrb[14].mxu0  ;;  %4169 = vmatpush3.bf16.msra.mxu0 %v4793_v10  ;;  %v4839_v9 = vld [vmem:[#allocation4 + $0x2d0] ss:$12 sps:$4 sm:$0xff]   ;;  %v4843_v10 = vld [vmem:[#allocation4 + $0x398] ss:$12 sps:$4 sm:$0xff]  }
 0x15a   :  { %v5336_v24 = vpack.c.bf16 %v4587_v0, %v4585_v1  ;;  %v5339_v25 = vadd.f32 %v445_v18, %v5292_v20  ;;  %v447_v26 = vpop.f32.mrb[15].mxu0  ;;  %1621 = vmatprep.subr.bf16.mxu1 %v4796_v11  ;;  %4170 = vmatprep.subr.bf16.mxu0 %v4797_v12  ;;  %v4799_v20 = vld [vmem:[#allocation4 + $0x210] ss:$12 sps:$4 sm:$0xff]   ;;  %v4846_v12 = vld [vmem:[#allocation4 + $0x2ec] ss:$12 sps:$4 sm:$0xff]  }
 0x15b   :  { %v5341_v29 = vpack.c.bf16 %v4588_v15, %v4586_v6  ;;  %v5344_v30 = vadd.f32 %v447_v26, %v5296_v22  ;;  %v4804_v22 = vld [vmem:[#allocation4 + $0x228] ss:$12 sps:$4 sm:$0xff]   ;;  %v4842_v6 = vld [vmem:[#allocation4 + $0x458] ss:$12 sps:$4 sm:$0xff]   ;;  %v4848_v14 = vld [vmem:[#allocation4 + $0x3b0] ss:$12 sps:$4 sm:$0xff]  }
 0x15c   :  { %v5347_v31 = vpack.c.bf16 %v5339_v25, %v4587_v0  ;;  %v557_v11 = vpack.c.bf16 %v5104_v62, %v5339_v25  ;;  %v4844_v0 = vld [vmem:[#allocation4 + $0x2e8] ss:$12 sps:$4 sm:$0xff]   ;;  %v4849_v18 = vld [vmem:[#allocation4 + $0x300] ss:$12 sps:$4 sm:$0xff]   ;;  %v4855_v26 = vld [vmem:[#allocation4 + $0x330] ss:$12 sps:$4 sm:$0xff]  }
 0x15d   :  { %v5350_v32 = vpack.c.bf16 %v5344_v30, %v4588_v15  ;;  %1622 = vmatpush1.bf16.msra.mxu1 %v4794_v21  ;;  %4171 = vmatpush3.bf16.msra.mxu0 %v4798_v23  ;;  %v558_v1 = vpack.c.bf16 %v5104_v62, %v5344_v30  ;;  %v4851_v15 = vld [vmem:[#allocation4 + $0x304] ss:$12 sps:$4 sm:$0xff]   ;;  %v4854_v21 = vld [vmem:[#allocation4 + $0x31c] ss:$12 sps:$4 sm:$0xff]   ;;  %v4857_v25 = vld [vmem:[#allocation4 + $0x334] ss:$12 sps:$4 sm:$0xff]  }
 0x15e   :  { %1623 = vmatprep.subr.bf16.mxu1 %v4801_v27  ;;  %4172 = vmatprep.subr.bf16.mxu0 %v4802_v28  ;;  %v4852_v23 = vld [vmem:[#allocation4 + $0x318] ss:$12 sps:$4 sm:$0xff]   ;;  %v4861_v28 = vld [vmem:[#allocation4 + $0x360] ss:$12 sps:$4 sm:$0xff]   ;;  %v4866_v30 = vld [vmem:[#allocation4 + $0x37c] ss:$12 sps:$4 sm:$0xff]  }
 0x15f   :  { %1600 = vmatprep.mubr.bf16.mxu1 %v5350_v32  ;;  %1813 = vmatprep.mubr.bf16.mxu0 %v5350_v32  ;;  %v4860_v27 = vld [vmem:[#allocation4 + $0x34c] ss:$12 sps:$4 sm:$0xff]  }
 0x160   :  { %1601 = vmatmul.mubr.bf16.gmra.mrb[12].mxu1 %v5347_v31  ;;  %1814 = vmatmul.mubr.bf16.gmra.mrb[28].mxu0 %v5347_v31 }
 0x161   :  { %1624 = vmatpush1.bf16.msra.mxu1 %v4799_v20  ;;  %1643 = vmatprep.mubr.bf16.mxu1 %v5307_v48  ;;  %v4864_v20 = vld [vmem:[#allocation4 + $0x378] ss:$12 sps:$4 sm:$0xff]  }
 0x162   :  { %4173 = vmatpush3.bf16.msra.mxu0 %v4803_v33  ;;  %1854 = vmatprep.mubr.bf16.mxu0 %v5307_v48  ;;  %v4819_v48 = vld [vmem:[#allocation4 + $0x270] ss:$12 sps:$4 sm:$0xff]   ;;  %v4872_v33 = vld [vmem:[#allocation4 + $0x3ac] ss:$12 sps:$4 sm:$0xff]  }
 0x163   :  { %1625 = vmatprep.subr.bf16.mxu1 %v4806_v34  ;;  %4174 = vmatprep.subr.bf16.mxu0 %v4807_v35  ;;  %v4870_v34 = vld [vmem:[#allocation4 + $0x3a8] ss:$12 sps:$4 sm:$0xff]   ;;  %v4875_v35 = vld [vmem:[#allocation4 + $0x3c4] ss:$12 sps:$4 sm:$0xff]  }
 0x165   :  { %1626 = vmatpush1.bf16.msra.mxu1 %v4804_v22  ;;  %v4878_v22 = vld [vmem:[#allocation4 + $0x3dc] ss:$12 sps:$4 sm:$0xff]  }
 0x166   :  { %4175 = vmatpush3.bf16.msra.mxu0 %v4808_v36  ;;  %1627 = vmatprep.subr.bf16.mxu1 %v4811_v37  ;;  %v4876_v36 = vld [vmem:[#allocation4 + $0x3d8] ss:$12 sps:$4 sm:$0xff]   ;;  %v4881_v37 = vld [vmem:[#allocation4 + $0x3f4] ss:$12 sps:$4 sm:$0xff]  }
 0x167   :  { %4200 = vmatprep.subr.bf16.mxu0 %v4812_v38  ;;  %v4879_v38 = vld [vmem:[#allocation4 + $0x3f0] ss:$12 sps:$4 sm:$0xff]  }
 0x169   :  { %1628 = vmatpush1.bf16.msra.mxu1 %v4809_v39  ;;  %1855 = vmatmul.mubr.bf16.vlgmr.msra.gmra.mrb[32].mxu0 %v5304_v43  ;;  %v4884_v39 = vld [vmem:[#allocation4 + $0x40c] ss:$12 sps:$4 sm:$0xff]  }
 0x16a   :  { %1862 = vmatprep.mubr.bf16.mxu0 %v5323_v5  ;;  %4201 = vmatpush3.bf16.msra.mxu0 %v4813_v40  ;;  %v4882_v40 = vld [vmem:[#allocation4 + $0x408] ss:$12 sps:$4 sm:$0xff]  }
 0x16b   :  { %1629 = vmatprep.subr.bf16.mxu1 %v4816_v41  ;;  %4202 = vmatprep.subr.bf16.mxu0 %v4817_v42  ;;  %v4887_v41 = vld [vmem:[#allocation4 + $0x424] ss:$12 sps:$4 sm:$0xff]   ;;  %v4890_v42 = vld [vmem:[#allocation4 + $0x43c] ss:$12 sps:$4 sm:$0xff]  }
 0x16d   :  { %1630 = vmatpush1.bf16.msra.mxu1 %v4814_v44  ;;  %v4888_v44 = vld [vmem:[#allocation4 + $0x438] ss:$12 sps:$4 sm:$0xff]  }
 0x16e   :  { %4203 = vmatpush3.bf16.msra.mxu0 %v4818_v45  ;;  %1631 = vmatprep.subr.bf16.mxu1 %v4821_v46  ;;  %v4893_v45 = vld [vmem:[#allocation4 + $0x454] ss:$12 sps:$4 sm:$0xff]   ;;  %v4891_v46 = vld [vmem:[#allocation4 + $0x450] ss:$12 sps:$4 sm:$0xff]  }
 0x16f   :  { %4204 = vmatprep.subr.bf16.mxu0 %v4822_v47  ;;  %v4896_v47 = vld [vmem:[#allocation4 + $0x46c] ss:$12 sps:$4 sm:$0xff]  }
 0x171   :  { %1632 = vmatpush1.bf16.msra.mxu1 %v4819_v48  ;;  %1863 = vmatmul.mubr.bf16.gmra.mrb[36].mxu0 %v5320_v63  ;;  %v4894_v48 = vld [vmem:[#allocation4 + $0x468] ss:$12 sps:$4 sm:$0xff]  }
 0x172   :  { %1870 = vmatprep.mubr.bf16.mxu0 %v5341_v29  ;;  %4205 = vmatpush3.bf16.msra.mxu0 %v4823_v49  ;;  %v4897_v49 = vld [vmem:[#allocation6 + $0x80] sm:$0xff]  }
 0x173   :  { %1633 = vmatprep.subr.bf16.mxu1 %v4826_v52  ;;  %4206 = vmatprep.subr.bf16.mxu0 %v4827_v53  ;;  %v4898_v52 = vld [vmem:[#allocation6 + $0x88] sm:$0xff]   ;;  %v4899_v53 = vld [vmem:[#allocation6 + $0x90] sm:$0xff]  }
 0x175   :  { %1634 = vmatpush1.bf16.msra.mxu1 %v4824_v54  ;;  %v4900_v54 = vld [vmem:[#allocation6 + $0x98] sm:$0xff]  }
 0x176   :  { %4207 = vmatpush3.bf16.msra.mxu0 %v4828_v55  ;;  %1635 = vmatprep.subr.bf16.mxu1 %v4831_v56  ;;  %v4902_v55 = vld [vmem:[#allocation6 + $0xa8] sm:$0xff]   ;;  %v4914_v56 = vld [vmem:[#allocation6] sm:$0xff]  }
 0x177   :  { %4208 = vmatprep.subr.bf16.mxu0 %v4832_v57  ;;  %v4916_v57 = vld [vmem:[#allocation6 + $0x48] sm:$0xff]  }
 0x179   :  { %1636 = vmatpush1.bf16.msra.mxu1 %v4829_v58  ;;  %1871 = vmatmul.mubr.bf16.gmra.mrb[40].mxu0 %v5336_v24  ;;  %v4917_v58 = vld [vmem:[#allocation6 + $0x8] sm:$0xff]  }
 0x17a   :  { %1878 = vmatprep.mubr.bf16.mxu0 %v558_v1  ;;  %4209 = vmatpush3.bf16.msra.mxu0 %v4833_v59  ;;  %v4919_v59 = vld [vmem:[#allocation6 + $0x50] sm:$0xff]  }
 0x17b   :  { %1637 = vmatprep.subr.bf16.mxu1 %v4836_v60  ;;  %4210 = vmatprep.subr.bf16.mxu0 %v4837_v61  ;;  %v4920_v60 = vld [vmem:[#allocation6 + $0x10] sm:$0xff]   ;;  %v4922_v61 = vld [vmem:[#allocation6 + $0x58] sm:$0xff]  }
 0x17d   :  { %1638 = vmatpush1.bf16.msra.mxu1 %v4834_v2  ;;  %v4925_v2 = vld [vmem:[#allocation6 + $0x60] sm:$0xff]  }
 0x17e   :  { %4211 = vmatpush3.bf16.msra.mxu0 %v4838_v3  ;;  %1639 = vmatprep.subr.bf16.mxu1 %v4841_v4  ;;  %v4926_v3 = vld [vmem:[#allocation6 + $0x20] sm:$0xff]   ;;  %v4928_v4 = vld [vmem:[#allocation6 + $0x68] sm:$0xff]  }
 0x17f   :  { %4212 = vmatprep.subr.bf16.mxu0 %v4842_v6  ;;  %v4929_v6 = vld [vmem:[#allocation6 + $0x28] sm:$0xff]  }
 0x181   :  { %1640 = vmatpush1.bf16.msra.mxu1 %v4839_v9  ;;  %1879 = vmatmul.mubr.bf16.gmra.mrb[44].mxu0 %v557_v11  ;;  %v4931_v9 = vld [vmem:[#allocation6 + $0x70] sm:$0xff]  }
 0x182   :  { %4213 = vmatpush3.bf16.msra.mxu0 %v4843_v10  ;;  %1919 = vmatprep.mubr.bf16.mxu0 %v5312_v51  ;;  %v4932_v10 = vld [vmem:[#allocation6 + $0x30] sm:$0xff]  }
 0x183   :  { %1641 = vmatprep.subr.bf16.mxu1 %v4846_v12  ;;  %4214 = vmatprep.subr.bf16.mxu0 %v4847_v13 }
 0x185   :  { %1642 = vmatpush1.bf16.msra.mxu1 %v4844_v0 }
 0x186   :  { %4215 = vmatpush3.bf16.msra.mxu0 %v4848_v14  ;;  %1684 = vmatprep.subr.bf16.mxu1 %v4851_v15  ;;  %v4934_v14 = vld [vmem:[#allocation6 + $0x78] sm:$0xff]  }
 0x188   :  { %1644 = vmatmul.mubr.bf16.vlgmr.msra.gmra.mrb[0].mxu1 %v5304_v43  ;;  %v4858_v43 = vld [vmem:[#allocation4 + $0x348] ss:$12 sps:$4 sm:$0xff]  }
 0x189   :  { %1653 = vmatprep.mubr.bf16.mxu1 %v5323_v5  ;;  %1685 = vmatpush1.bf16.msra.mxu1 %v4849_v18  ;;  %v4863_v5 = vld [vmem:[#allocation4 + $0x364] ss:$12 sps:$4 sm:$0xff]   ;;  %v4935_v18 = vld [vmem:[#allocation6 + $0x38] sm:$0xff]  }
 0x18a   :  { %1920 = vmatmul.mubr.bf16.vlgmr.msra.gmra.mrb[48].mxu0 %v5310_v50  ;;  %1686 = vmatprep.subr.bf16.mxu1 %v4854_v21 }
 0x18b   :  { %1927 = vmatprep.mubr.bf16.mxu0 %v5328_v8 }
 0x18d   :  { %1687 = vmatpush1.bf16.msra.mxu1 %v4852_v23  ;;  %v765_v23 = vsub.s32 2, %v5283_v16 }
 0x18e   :  { %1688 = vmatprep.subr.bf16.mxu1 %v4857_v25  ;;  %v4937_v25 = vld [vmem:[#allocation6 + $0x100] sm:$0xff]  }
 0x190   :  { %1654 = vmatmul.mubr.bf16.gmra.mrb[4].mxu1 %v5320_v63  ;;  %v4869_v63 = vld [vmem:[#allocation4 + $0x394] ss:$12 sps:$4 sm:$0xff]  }
 0x191   :  { %1663 = vmatprep.mubr.bf16.mxu1 %v5341_v29  ;;  %1689 = vmatpush1.bf16.msra.mxu1 %v4855_v26  ;;  %v4867_v29 = vld [vmem:[#allocation4 + $0x390] ss:$12 sps:$4 sm:$0xff]   ;;  %v5399_v26 = vld [vmem:[%s5570_s4] sm:$0x7] }
 0x192   :  { %1928 = vmatmul.mubr.bf16.gmra.mrb[52].mxu0 %v5326_v7  ;;  %1690 = vmatprep.subr.bf16.mxu1 %v4860_v27 }
 0x193   :  { %1935 = vmatprep.mubr.bf16.mxu0 %v5350_v32 }
 0x195   :  { %1691 = vmatpush1.bf16.msra.mxu1 %v4858_v43 }
 0x196   :  { %1692 = vmatprep.subr.bf16.mxu1 %v4863_v5  ;;  %v766_v5 = vrot.slane %v5399_v26, %v765_v23 }
 0x198   :  { %1664 = vmatmul.mubr.bf16.gmra.mrb[8].mxu1 %v5336_v24  ;;  %v4873_v24 = vld [vmem:[#allocation4 + $0x3c0] ss:$12 sps:$4 sm:$0xff]  }
 0x199   :  { %1673 = vmatprep.mubr.bf16.mxu1 %v558_v1  ;;  %1693 = vmatpush1.bf16.msra.mxu1 %v4861_v28  ;;  %v4923_v1 = vld [vmem:[#allocation6 + $0x18] sm:$0xff]  }
 0x19a   :  { %1936 = vmatmul.mubr.bf16.gmra.mrb[56].mxu0 %v5347_v31  ;;  %1694 = vmatprep.subr.bf16.mxu1 %v4866_v30 }
 0x19d   :  { %1695 = vmatpush1.bf16.msra.mxu1 %v4864_v20 }
 0x19e   :  { %1696 = vmatprep.subr.bf16.mxu1 %v4869_v63 }
 0x1a0   :  { %1674 = vmatmul.mubr.bf16.gmra.mrb[16].mxu1 %v557_v11 }
 0x1a1   :  { %1697 = vmatpush1.bf16.msra.mxu1 %v4867_v29  ;;  %1716 = vmatprep.mubr.bf16.mxu1 %v5312_v51  ;;  %v4885_v51 = vld [vmem:[#allocation4 + $0x420] ss:$12 sps:$4 sm:$0xff]  }
 0x1a2   :  { %1698 = vmatprep.subr.bf16.mxu1 %v4872_v33 }
 0x1a5   :  { %1699 = vmatpush1.bf16.msra.mxu1 %v4870_v34 }
 0x1a6   :  { %1700 = vmatprep.subr.bf16.mxu1 %v4875_v35 }
 0x1a9   :  { %1701 = vmatpush1.bf16.msra.mxu1 %v4873_v24 }
 0x1aa   :  { %1702 = vmatprep.subr.bf16.mxu1 %v4878_v22 }
 0x1ad   :  { %1703 = vmatpush1.bf16.msra.mxu1 %v4876_v36 }
 0x1ae   :  { %1704 = vmatprep.subr.bf16.mxu1 %v4881_v37 }
 0x1b1   :  { %1705 = vmatpush1.bf16.msra.mxu1 %v4879_v38 }
 0x1b2   :  { %1706 = vmatprep.subr.bf16.mxu1 %v4884_v39 }
 0x1b5   :  { %1707 = vmatpush1.bf16.msra.mxu1 %v4882_v40 }
 0x1b6   :  { %1708 = vmatprep.subr.bf16.mxu1 %v4887_v41 }
 0x1b9   :  { %1709 = vmatpush1.bf16.msra.mxu1 %v4885_v51 }
 0x1ba   :  { %1710 = vmatprep.subr.bf16.mxu1 %v4890_v42 }
 0x1bd   :  { %1711 = vmatpush1.bf16.msra.mxu1 %v4888_v44 }
 0x1be   :  { %1712 = vmatprep.subr.bf16.mxu1 %v4893_v45 }
 0x1c1   :  { %1713 = vmatpush1.bf16.msra.mxu1 %v4891_v46 }
 0x1c2   :  { %1714 = vmatprep.subr.bf16.mxu1 %v4896_v47 }
 0x1c5   :  { %1715 = vmatpush1.bf16.msra.mxu1 %v4894_v48 }
 0x1c6   :  { %4435 = vmatprep.subr.bf16.mxu1 %v5104_v62 }
 0x1c8   :  { %1717 = vmatmul.mubr.bf16.vlgmr.msra.gmra.mrb[0].mxu1 %v5310_v50  ;;  %v4901_v50 = vld [vmem:[#allocation6 + $0xa0] sm:$0xff]  }
 0x1c9   :  { %1726 = vmatprep.mubr.bf16.mxu1 %v5328_v8  ;;  %4436 = vmatpush3.bf16.msra.mxu1 %v4897_v49  ;;  %v5105_v8 = vmov 0.0|0.0  }
 0x1ca   :  { %4437 = vmatprep.subr.bf16.mxu1 %v5104_v62  ;;  %1943 = vmatprep.mubr.bf16.mxu0 %v5105_v8 }
 0x1cb   :  { %1944 = vmatmul.mubr.bf16.gmra.mrb[60].mxu0 %v5105_v8 }
 0x1cd   :  { %4438 = vmatpush3.bf16.msra.mxu1 %v4898_v52 }
 0x1ce   :  { %4439 = vmatprep.subr.bf16.mxu1 %v5104_v62 }
 0x1d0   :  { %1727 = vmatmul.mubr.bf16.gmra.mrb[4].mxu1 %v5326_v7  ;;  %v4903_v7 = vld [vmem:[#allocation6 + $0xb0] sm:$0xff]  }
 0x1d1   :  { %1736 = vmatprep.mubr.bf16.mxu1 %v5350_v32  ;;  %4440 = vmatpush3.bf16.msra.mxu1 %v4899_v53  ;;  %v4904_v32 = vld [vmem:[#allocation6 + $0xb8] sm:$0xff]  }
 0x1d2   :  { %4441 = vmatprep.subr.bf16.mxu1 %v5104_v62 }
 0x1d5   :  { %4442 = vmatpush3.bf16.msra.mxu1 %v4900_v54 }
 0x1d6   :  { %4443 = vmatprep.subr.bf16.mxu1 %v5104_v62 }
 0x1d8   :  { %1737 = vmatmul.mubr.bf16.gmra.mrb[8].mxu1 %v5347_v31  ;;  %v4913_v31 = vld [vmem:[#allocation6 + $0x40] sm:$0xff]  }
 0x1d9   :  { %4444 = vmatpush3.bf16.msra.mxu1 %v4901_v50  ;;  %1746 = vmatprep.mubr.bf16.mxu1 %v5105_v8 }
 0x1da   :  { %4445 = vmatprep.subr.bf16.mxu1 %v5104_v62  ;;  %4240 = vmatprep.subr.bf16.mxu0 %v4913_v31 }
 0x1db   :  { %4241 = vmatpush3.bf16.msra.mxu0 %v4914_v56 }
 0x1dc   :  { %4242 = vmatprep.subr.bf16.mxu0 %v4916_v57 }
 0x1dd   :  { %4446 = vmatpush3.bf16.msra.mxu1 %v4902_v55 }
 0x1de   :  { %4447 = vmatprep.subr.bf16.mxu1 %v5104_v62 }
 0x1df   :  { %4243 = vmatpush3.bf16.msra.mxu0 %v4917_v58 }
 0x1e0   :  { %1747 = vmatmul.mubr.bf16.gmra.mrb[20].mxu1 %v5105_v8  ;;  %4244 = vmatprep.subr.bf16.mxu0 %v4919_v59 }
 0x1e1   :  { %4448 = vmatpush3.bf16.msra.mxu1 %v4903_v7  ;;  %4451 = vmatprep.mubr.msk.bf16.mxu1 %vm5106_vm2, %v5104_v62 }
 0x1e2   :  { %4449 = vmatprep.subr.bf16.mxu1 %v5104_v62 }
 0x1e3   :  { %4245 = vmatpush3.bf16.msra.mxu0 %v4920_v60 }
 0x1e4   :  { %4246 = vmatprep.subr.bf16.mxu0 %v4922_v61 }
 0x1e5   :  { %4450 = vmatpush3.bf16.msra.mxu1 %v4904_v32 }
 0x1e6   :  { %4455 = vmatprep.subr.bf16.mxu1 %v5104_v62 }
 0x1e7   :  { %4247 = vmatpush3.bf16.msra.mxu0 %v4923_v1 }
 0x1e8   :  { %4248 = vmatprep.subr.bf16.mxu0 %v4925_v2 }
 0x1eb   :  { %4249 = vmatpush3.bf16.msra.mxu0 %v4926_v3 }
 0x1ec   :  { %4250 = vmatprep.subr.bf16.mxu0 %v4928_v4 }
 0x1ef   :  { %4251 = vmatpush3.bf16.msra.mxu0 %v4929_v6 }
 0x1f0   :  { %4252 = vmatprep.subr.bf16.mxu0 %v4931_v9 }
 0x1f3   :  { %4253 = vmatpush3.bf16.msra.mxu0 %v4932_v10 }
 0x1f4   :  { %4254 = vmatprep.subr.bf16.mxu0 %v4934_v14 }
 0x1f7   :  { %4255 = vmatpush3.bf16.msra.mxu0 %v4935_v18 }
 0x1f8   :  { %4271 = vmatprep.subr.bf16.mxu0 %v4937_v25 }
 0x21b   :  { %v4136_v11 = vpop.f32.mrb[16].mxu0 }
 0x21c   :  { %v4137_v12 = vpop.f32.mrb[17].mxu0 }
 0x21d   :  { %v4138_v13 = vadd.f32 %v4137_v12, %v4136_v11  ;;  %v4139_v0 = vpop.f32.mrb[18].mxu0 }
 0x21e   :  { %v4140_v15 = vpop.f32.mrb[19].mxu0 }
 0x21f   :  { %v4141_v21 = vadd.f32 %v4140_v15, %v4139_v0  ;;  %v1792_v52 = vadd.f32 %v4138_v13, %v766_v5 }
 0x221   :  { %v1795_v8 = vadd.f32 %v4141_v21, %v766_v5 }
 0x223   :  { %v4142_v27 = vpop.f32.mrb[20].mxu0 }
 0x224   :  { %v4143_v43 = vpop.f32.mrb[21].mxu0 }
 0x225   :  { %v4144_v28 = vadd.f32 %v4143_v43, %v4142_v27  ;;  %v4145_v30 = vpop.f32.mrb[22].mxu0 }
 0x226   :  { %v4146_v20 = vpop.f32.mrb[23].mxu0 }
 0x227   :  { %v1800_v63 = vadd.f32 %v4144_v28, %v766_v5  ;;  %v4147_v29 = vadd.f32 %v4146_v20, %v4145_v30  ;;  %v4905_v28 = vld [vmem:[#allocation6 + $0x140] sm:$0xff]  }
 0x229   :  { %v1803_v33 = vadd.f32 %v4147_v29, %v766_v5 }
 0x22b   :  { %v4148_v34 = vpop.f32.mrb[24].mxu0 }
 0x22c   :  { %v4149_v35 = vpop.f32.mrb[25].mxu0 }
 0x22d   :  { %v4150_v24 = vadd.f32 %v4149_v35, %v4148_v34  ;;  %v4151_v22 = vpop.f32.mrb[26].mxu0 }
 0x22e   :  { %v4152_v36 = vpop.f32.mrb[27].mxu0 }
 0x22f   :  { %v1808_v37 = vadd.f32 %v4150_v24, %v766_v5  ;;  %v4153_v38 = vadd.f32 %v4152_v36, %v4151_v22 }
 0x231   :  { %v1811_v39 = vadd.f32 %v4153_v38, %v766_v5 }
 0x233   :  { %v1602_v40 = vpop.f32.mrb[12].mxu1  ;;  %v4154_v41 = vpop.f32.mrb[28].mxu0 }
 0x234   :  { %v1604_v51 = vpop.f32.mrb[13].mxu1  ;;  %v4155_v42 = vpop.f32.mrb[29].mxu0  ;;  %v4908_v41 = vld [vmem:[#allocation6 + $0x158] sm:$0xff]  }
 0x235   :  { %v1606_v44 = vpop.f32.mrb[14].mxu1  ;;  %v4157_v45 = vpop.f32.mrb[30].mxu0 }
 0x236   :  { %v1608_v46 = vpop.f32.mrb[15].mxu1  ;;  %v4158_v47 = vpop.f32.mrb[31].mxu0 }
 0x237   :  { %v4909_v47 = vld [vmem:[#allocation6 + $0x160] sm:$0xff]  }
 0x23c   :  { %v4176_v48 = vpop.f32.mrb[32].mxu0 }
 0x23d   :  { %v4177_v49 = vpop.f32.mrb[33].mxu0 }
 0x23e   :  { %v4178_v53 = vadd.f32 %v4177_v49, %v4176_v48  ;;  %v4179_v54 = vpop.f32.mrb[34].mxu0 }
 0x23f   :  { %v4180_v50 = vpop.f32.mrb[35].mxu0 }
 0x240   :  { %v1857_v55 = vadd.f32 %v4178_v53, %v1792_v52  ;;  %v4181_v7 = vadd.f32 %v4180_v50, %v4179_v54  ;;  %v4910_v50 = vld [vmem:[#allocation6 + $0x168] sm:$0xff]  }
 0x242   :  { %v1860_v32 = vadd.f32 %v4181_v7, %v1795_v8  ;;  %v4911_v8 = vld [vmem:[#allocation6 + $0x170] sm:$0xff]   ;;  %v4915_v7 = vld [vmem:[#allocation6 + $0x200] sm:$0xff]  }
 0x244   :  { %v4182_v31 = vpop.f32.mrb[36].mxu0 }
 0x245   :  { %v4183_v56 = vpop.f32.mrb[37].mxu0 }
 0x246   :  { %v4184_v57 = vadd.f32 %v4183_v56, %v4182_v31  ;;  %v4185_v58 = vpop.f32.mrb[38].mxu0  ;;  %v4918_v31 = vld [vmem:[#allocation6 + $0x208] sm:$0xff]   ;;  %v4921_v56 = vld [vmem:[#allocation6 + $0x210] sm:$0xff]  }
 0x247   :  { %v4186_v59 = vpop.f32.mrb[39].mxu0 }
 0x248   :  { %v1865_v60 = vadd.f32 %v4184_v57, %v1800_v63  ;;  %v4187_v61 = vadd.f32 %v4186_v59, %v4185_v58  ;;  %v4924_v57 = vld [vmem:[#allocation6 + $0x218] sm:$0xff]   ;;  %v4927_v58 = vld [vmem:[#allocation6 + $0x220] sm:$0xff]   ;;  %v4930_v59 = vld [vmem:[#allocation6 + $0x228] sm:$0xff]  }
 0x24a   :  { %v1868_v1 = vadd.f32 %v4187_v61, %v1803_v33  ;;  %v4906_v33 = vld [vmem:[#allocation6 + $0x148] sm:$0xff]   ;;  %v5435_v61 = vrot.slane %v5399_v26, %v184_v19  ;;  %v4938_v19 = vld [vmem:[#allocation6 + $0xc0] sm:$0xff]  }
 0x24c   :  { %v4188_v2 = vpop.f32.mrb[40].mxu0 }
 0x24d   :  { %v4189_v3 = vpop.f32.mrb[41].mxu0 }
 0x24e   :  { %v4190_v4 = vadd.f32 %v4189_v3, %v4188_v2  ;;  %v4191_v6 = vpop.f32.mrb[42].mxu0 }
 0x24f   :  { %v4192_v9 = vpop.f32.mrb[43].mxu0 }
 0x250   :  { %v1873_v10 = vadd.f32 %v4190_v4, %v1808_v37  ;;  %v4193_v11 = vadd.f32 %v4192_v9, %v4191_v6  ;;  %v4907_v37 = vld [vmem:[#allocation6 + $0x150] sm:$0xff]  }
 0x252   :  { %v1876_v12 = vadd.f32 %v4193_v11, %v1811_v39 }
 0x254   :  { %v4194_v13 = vpop.f32.mrb[44].mxu0 }
 0x255   :  { %v4195_v0 = vpop.f32.mrb[45].mxu0 }
 0x256   :  { %v4197_v14 = vpop.f32.mrb[46].mxu0  ;;  %v4939_v0 = vld [vmem:[#allocation6 + $0x2c0] sm:$0xff]  }
 0x257   :  { %v4198_v15 = vpop.f32.mrb[47].mxu0 }
 0x25d   :  { %v4216_v18 = vpop.f32.mrb[48].mxu0 }
 0x25e   :  { %v4217_v21 = vpop.f32.mrb[49].mxu0 }
 0x25f   :  { %v4218_v23 = vadd.f32 %v4217_v21, %v4216_v18  ;;  %v4219_v25 = vpop.f32.mrb[50].mxu0  ;;  %v4941_v18 = vld [vmem:[#allocation6 + $0xc8] sm:$0xff]  }
 0x260   :  { %v4220_v27 = vpop.f32.mrb[51].mxu0 }
 0x261   :  { %v1922_v43 = vadd.f32 %v4218_v23, %v1857_v55  ;;  %v4221_v5 = vadd.f32 %v4220_v27, %v4219_v25  ;;  %v4912_v55 = vld [vmem:[#allocation6 + $0x178] sm:$0xff]   ;;  %v4943_v25 = vld [vmem:[#allocation6 + $0x110] sm:$0xff]  }
 0x263   :  { %v1982_v30 = vpack.c.bf16 %v1922_v43, %v1922_v43  ;;  %v1925_v20 = vadd.f32 %v4221_v5, %v1860_v32 }
 0x265   :  { %v4222_v63 = vpop.f32.mrb[52].mxu0  ;;  %4452 = vmatmul.mubr.bf16.vlgmr.msra.gmra.mrb[24].mxu1 %v1982_v30  ;;  %v2268_v32 = vpack.c.bf16 %v1925_v20, %v1925_v20  ;;  %v4944_v20 = vld [vmem:[#allocation6 + $0xd0] sm:$0xff]  }
 0x266   :  { %4456 = vmatpush3.bf16.msra.mxu1 %v4905_v28  ;;  %v4223_v29 = vpop.f32.mrb[53].mxu0  ;;  %4471 = vmatprep.mubr.msk.bf16.mxu1 %vm5106_vm2, %v5104_v62  ;;  %v4942_v28 = vld [vmem:[#allocation6 + $0x2c8] sm:$0xff]  }
 0x267   :  { %v4224_v34 = vadd.f32 %v4223_v29, %v4222_v63  ;;  %v4225_v35 = vpop.f32.mrb[54].mxu0  ;;  %4457 = vmatprep.subr.bf16.mxu1 %v5104_v62  ;;  %v4946_v63 = vld [vmem:[#allocation6 + $0x118] sm:$0xff]   ;;  %v4945_v29 = vld [vmem:[#allocation6 + $0x2d0] sm:$0xff]  }
 0x268   :  { %v4226_v24 = vpop.f32.mrb[55].mxu0 }
 0x269   :  { %v5405_v22 = vadd.f32 %v4224_v34, %v1865_v60  ;;  %v4227_v36 = vadd.f32 %v4226_v24, %v4225_v35  ;;  %v5430_v60 = vrot.slane %v5399_v26, %v180_v17  ;;  %v4947_v34 = vld [vmem:[#allocation6 + $0xd8] sm:$0xff]  }
 0x26a   :  { %4458 = vmatpush3.bf16.msra.mxu1 %v4906_v33 }
 0x26b   :  { %v5407_v38 = vadd.f32 %v4227_v36, %v1868_v1  ;;  %4459 = vmatprep.subr.bf16.mxu1 %v5104_v62  ;;  %v4933_v1 = vld [vmem:[#allocation6 + $0x230] sm:$0xff]   ;;  %v2548_v14 = vpack.c.bf16 %v5405_v22, %v5405_v22  ;;  %v4949_v22 = vld [vmem:[#allocation6 + $0x120] sm:$0xff]  }
 0x26d   :  { %v4228_v39 = vpop.f32.mrb[56].mxu0 }
 0x26e   :  { %4460 = vmatpush3.bf16.msra.mxu1 %v4907_v37  ;;  %v4229_v40 = vpop.f32.mrb[57].mxu0 }
 0x26f   :  { %v4230_v51 = vadd.f32 %v4229_v40, %v4228_v39  ;;  %v4231_v42 = vpop.f32.mrb[58].mxu0  ;;  %4461 = vmatprep.subr.bf16.mxu1 %v5104_v62 }
 0x270   :  { %v4232_v44 = vpop.f32.mrb[59].mxu0 }
 0x271   :  { %v5411_v45 = vadd.f32 %v4230_v51, %v1873_v10  ;;  %v4233_v46 = vadd.f32 %v4232_v44, %v4231_v42  ;;  %v4936_v10 = vld [vmem:[#allocation6 + $0x238] sm:$0xff]  }
 0x272   :  { %4462 = vmatpush3.bf16.msra.mxu1 %v4908_v41  ;;  %v4948_v51 = vld [vmem:[#allocation6 + $0x2d8] sm:$0xff]  }
 0x273   :  { %v5413_v48 = vadd.f32 %v4233_v46, %v1876_v12  ;;  %v1675_v49 = vpop.f32.mrb[16].mxu1  ;;  %4463 = vmatprep.subr.bf16.mxu1 %v5104_v62  ;;  %v4940_v12 = vld [vmem:[#allocation6 + $0x108] sm:$0xff]   ;;  %v4950_v46 = vld [vmem:[#allocation6 + $0xe0] sm:$0xff]  }
 0x274   :  { %v1677_v52 = vpop.f32.mrb[17].mxu1  ;;  %v4952_v49 = vld [vmem:[#allocation6 + $0x128] sm:$0xff]  }
 0x275   :  { %v1679_v53 = vpop.f32.mrb[18].mxu1 }
 0x276   :  { %4464 = vmatpush3.bf16.msra.mxu1 %v4909_v47  ;;  %v1681_v54 = vpop.f32.mrb[19].mxu1  ;;  %v4951_v53 = vld [vmem:[#allocation6 + $0x2e0] sm:$0xff]  }
 0x277   :  { %4465 = vmatprep.subr.bf16.mxu1 %v5104_v62  ;;  %v4953_v54 = vld [vmem:[#allocation6 + $0xe8] sm:$0xff]  }
 0x27a   :  { %4466 = vmatpush3.bf16.msra.mxu1 %v4910_v50 }
 0x27b   :  { %4467 = vmatprep.subr.bf16.mxu1 %v5104_v62 }
 0x27e   :  { %4468 = vmatpush3.bf16.msra.mxu1 %v4911_v8  ;;  %v4955_v8 = vld [vmem:[#allocation6 + $0x130] sm:$0xff]  }
 0x27f   :  { %4469 = vmatprep.subr.bf16.mxu1 %v5104_v62 }
 0x282   :  { %4470 = vmatpush3.bf16.msra.mxu1 %v4912_v55 }
 0x283   :  { %4475 = vmatprep.subr.bf16.mxu1 %v5104_v62 }
 0x285   :  { %4472 = vmatmul.mubr.bf16.vlgmr.msra.gmra.mrb[24].mxu1 %v2268_v32  ;;  %v4954_v32 = vld [vmem:[#allocation6 + $0x2e8] sm:$0xff]  }
 0x286   :  { %4476 = vmatpush3.bf16.msra.mxu1 %v4915_v7  ;;  %4491 = vmatprep.mubr.msk.bf16.mxu1 %vm5106_vm2, %v5104_v62 }
 0x287   :  { %4477 = vmatprep.subr.bf16.mxu1 %v5104_v62 }
 0x28a   :  { %4478 = vmatpush3.bf16.msra.mxu1 %v4918_v31 }
 0x28b   :  { %4479 = vmatprep.subr.bf16.mxu1 %v5104_v62 }
 0x28e   :  { %4480 = vmatpush3.bf16.msra.mxu1 %v4921_v56  ;;  %v4956_v56 = vld [vmem:[#allocation6 + $0xf0] sm:$0xff]  }
 0x28f   :  { %4481 = vmatprep.subr.bf16.mxu1 %v5104_v62 }
 0x292   :  { %4482 = vmatpush3.bf16.msra.mxu1 %v4924_v57  ;;  %v4958_v57 = vld [vmem:[#allocation6 + $0x138] sm:$0xff]  }
 0x293   :  { %4483 = vmatprep.subr.bf16.mxu1 %v5104_v62 }
 0x296   :  { %4484 = vmatpush3.bf16.msra.mxu1 %v4927_v58  ;;  %v4957_v58 = vld [vmem:[#allocation6 + $0x2f0] sm:$0xff]  }
 0x297   :  { %4485 = vmatprep.subr.bf16.mxu1 %v5104_v62 }
 0x29a   :  { %4486 = vmatpush3.bf16.msra.mxu1 %v4930_v59  ;;  %v4959_v59 = vld [vmem:[#allocation6 + $0xf8] sm:$0xff]  }
 0x29b   :  { %v1718_v2 = vpop.f32.mrb[0].mxu1  ;;  %4487 = vmatprep.subr.bf16.mxu1 %v5104_v62 }
 0x29c   :  { %v4591_v3 = vadd.f32 %v1718_v2, %v5430_v60  ;;  %v1720_v4 = vpop.f32.mrb[1].mxu1  ;;  %v4961_v2 = vld [vmem:[#allocation6 + $0x1c0] sm:$0xff]  }
 0x29d   :  { %v4592_v6 = vadd.f32 %v1720_v4, %v5435_v61  ;;  %v5440_v9 = vpop.f32.mrb[2].mxu1  ;;  %v4960_v4 = vld [vmem:[#allocation6 + $0x2f8] sm:$0xff]  }
 0x29e   :  { %4488 = vmatpush3.bf16.msra.mxu1 %v4933_v1  ;;  %v1724_v17 = vpop.f32.mrb[3].mxu1  ;;  %v1980_v26 = vpack.c.bf16 %v4591_v3, %v4591_v3  ;;  %v4234_v39 = vpop.f32.mrb[60].mxu0  ;;  %v4593_v1 = vadd.f32 %v5440_v9, %v5430_v60  ;;  %v4965_v9 = vld [vmem:[#allocation6 + $0x188] sm:$0xff]  }
 0x29f   :  { %v1981_v11 = vpack.c.bf16 %v4592_v6, %v4592_v6  ;;  %v4594_v16 = vadd.f32 %v1724_v17, %v5435_v61  ;;  %4489 = vmatprep.subr.bf16.mxu1 %v5104_v62  ;;  %v4235_v42 = vpop.f32.mrb[61].mxu0  ;;  %v4962_v6 = vld [vmem:[#allocation6 + $0x180] sm:$0xff]  }
 0x2a0   :  { %v4237_v47 = vpop.f32.mrb[62].mxu0  ;;  %v2266_v17 = vpack.c.bf16 %v4593_v1, %v4593_v1  ;;  %v4989_v42 = vld [vmem:[#allocation6 + $0x248] sm:$0xff]   ;;  %v5008_v1 = vld [vmem:[#allocation6 + $0x478] sm:$0xff]  }
 0x2a1   :  { %v2267_v13 = vpack.c.bf16 %v4594_v16, %v4594_v16  ;;  %2207 = vmatprep.mubr.bf16.mxu0 %v1981_v11  ;;  %v4238_v52 = vpop.f32.mrb[63].mxu0  ;;  %v4963_v16 = vld [vmem:[#allocation6 + $0x380] sm:$0xff]   ;;  %v4994_v47 = vld [vmem:[#allocation6 + $0x298] sm:$0xff]  }
 0x2a2   :  { %4490 = vmatpush3.bf16.msra.mxu1 %v4936_v10  ;;  %2208 = vmatmul.mubr.bf16.vlgmr.msra.gmra.mrb[64].mxu0 %v1980_v26  ;;  %v4964_v10 = vld [vmem:[#allocation6 + $0x1c8] sm:$0xff]   ;;  %v4968_v26 = vld [vmem:[#allocation6 + $0x190] sm:$0xff]   ;;  %v4997_v52 = vld [vmem:[#allocation6 + $0x2a0] sm:$0xff]  }
 0x2a3   :  { %4272 = vmatpush3.bf16.msra.mxu0 %v4938_v19  ;;  %v1728_v15 = vpop.f32.mrb[4].mxu1  ;;  %2493 = vmatprep.mubr.bf16.mxu0 %v2267_v13  ;;  %v4966_v19 = vld [vmem:[#allocation6 + $0x388] sm:$0xff]   ;;  %v4971_v13 = vld [vmem:[#allocation6 + $0x198] sm:$0xff]  }
 0x2a4   :  { %v5447_v21 = vadd.f32 %v1728_v15, %v5430_v60  ;;  %4495 = vmatprep.subr.bf16.mxu1 %v5104_v62  ;;  %v5450_v23 = vpop.f32.mrb[5].mxu1  ;;  %4273 = vmatprep.subr.bf16.mxu0 %v4940_v12  ;;  %v4970_v12 = vld [vmem:[#allocation6 + $0x1d8] sm:$0xff]   ;;  %v4974_v15 = vld [vmem:[#allocation6 + $0x1a0] sm:$0xff]  }
 0x2a5   :  { %4492 = vmatmul.mubr.bf16.vlgmr.msra.gmra.mrb[24].mxu1 %v2548_v14  ;;  %v1732_v27 = vpop.f32.mrb[6].mxu1  ;;  %v4596_v3 = vadd.f32 %v5450_v23, %v5435_v61  ;;  %v4972_v14 = vld [vmem:[#allocation6 + $0x398] sm:$0xff]   ;;  %v4975_v23 = vld [vmem:[#allocation6 + $0x3a0] sm:$0xff]  }
 0x2a6   :  { %4496 = vmatpush3.bf16.msra.mxu1 %v4939_v0  ;;  %v5453_v43 = vadd.f32 %v1732_v27, %v5430_v60  ;;  %v1734_v5 = vpop.f32.mrb[7].mxu1  ;;  %4511 = vmatprep.mubr.msk.bf16.mxu1 %vm5106_vm2, %v5104_v62  ;;  %v4973_v0 = vld [vmem:[#allocation6 + $0x1e0] sm:$0xff]   ;;  %v4979_v27 = vld [vmem:[#allocation6 + $0x1f0] sm:$0xff]  }
 0x2a7   :  { %v5458_v30 = vadd.f32 %v1734_v5, %v5435_v61  ;;  %4274 = vmatpush3.bf16.msra.mxu0 %v4941_v18  ;;  %4497 = vmatprep.subr.bf16.mxu1 %v5104_v62  ;;  %v2547_v11 = vpack.c.bf16 %v4596_v3, %v4596_v3  ;;  %v4976_v18 = vld [vmem:[#allocation6 + $0x1e8] sm:$0xff]  }
 0x2a8   :  { %4275 = vmatprep.subr.bf16.mxu0 %v4943_v25  ;;  %v4977_v25 = vld [vmem:[#allocation6 + $0x1a8] sm:$0xff]   ;;  %v2826_v3 = vpack.c.bf16 %v5453_v43, %v5453_v43  ;;  %v5015_v43 = vld [vmem:[#allocation6 + $0x358] sm:$0xff]  }
 0x2a9   :  { %v4978_v5 = vld [vmem:[#allocation6 + $0x3a8] sm:$0xff]   ;;  %v2827_v39 = vpack.c.bf16 %v5458_v30, %v5458_v30  ;;  %v4992_v30 = vld [vmem:[#allocation6 + $0x250] sm:$0xff]  }
 0x2aa   :  { %4498 = vmatpush3.bf16.msra.mxu1 %v4942_v28  ;;  %v4980_v28 = vld [vmem:[#allocation6 + $0x1b0] sm:$0xff]  }
 0x2ab   :  { %4276 = vmatpush3.bf16.msra.mxu0 %v4944_v20  ;;  %v1738_v33 = vpop.f32.mrb[8].mxu1  ;;  %4499 = vmatprep.subr.bf16.mxu1 %v5104_v62  ;;  %v4982_v20 = vld [vmem:[#allocation6 + $0x1f8] sm:$0xff]  }
 0x2ac   :  { %v5463_v35 = vadd.f32 %v1738_v33, %v5430_v60  ;;  %v1740_v24 = vpop.f32.mrb[9].mxu1  ;;  %4277 = vmatprep.subr.bf16.mxu0 %v4946_v63  ;;  %v4981_v63 = vld [vmem:[#allocation6 + $0x3b0] sm:$0xff]   ;;  %v4985_v33 = vld [vmem:[#allocation6 + $0x280] sm:$0xff]  }
 0x2ad   :  { %v5466_v36 = vadd.f32 %v1740_v24, %v5435_v61  ;;  %v1742_v37 = vpop.f32.mrb[10].mxu1  ;;  %v4986_v24 = vld [vmem:[#allocation6 + $0x240] sm:$0xff]  }
 0x2ae   :  { %4500 = vmatpush3.bf16.msra.mxu1 %v4945_v29  ;;  %v5469_v40 = vadd.f32 %v1742_v37, %v5430_v60  ;;  %v1744_v41 = vpop.f32.mrb[11].mxu1  ;;  %v2828_v60 = vpack.c.bf16 %v5407_v38, %v5407_v38  ;;  %v4969_v38 = vld [vmem:[#allocation6 + $0x390] sm:$0xff]   ;;  %v4983_v29 = vld [vmem:[#allocation6 + $0x1b8] sm:$0xff]   ;;  %v4988_v37 = vld [vmem:[#allocation6 + $0x288] sm:$0xff]  }
 0x2af   :  { %v5472_v44 = vadd.f32 %v1744_v41, %v5435_v61  ;;  %4278 = vmatpush3.bf16.msra.mxu0 %v4947_v34  ;;  %4501 = vmatprep.subr.bf16.mxu1 %v5104_v62  ;;  %v4967_v61 = vld [vmem:[#allocation6 + $0x1d0] sm:$0xff]   ;;  %v4984_v34 = vld [vmem:[#allocation6 + $0x3b8] sm:$0xff]   ;;  %v4987_v41 = vld [vmem:[#allocation6 + $0x440] sm:$0xff]  }
 0x2b0   :  { %4279 = vmatprep.subr.bf16.mxu0 %v4949_v22  ;;  %v2546_v22 = vpack.c.bf16 %v5447_v21, %v5447_v21  ;;  %v4990_v21 = vld [vmem:[#allocation6 + $0x448] sm:$0xff]  }
 0x2b2   :  { %4502 = vmatpush3.bf16.msra.mxu1 %v4948_v51  ;;  %v3108_v51 = vpack.c.bf16 %v5411_v45, %v5411_v45  ;;  %v4993_v45 = vld [vmem:[#allocation6 + $0x450] sm:$0xff]  }
 0x2b3   :  { %4280 = vmatpush3.bf16.msra.mxu0 %v4950_v46  ;;  %4503 = vmatprep.subr.bf16.mxu1 %v5104_v62  ;;  %v1748_v50 = vpop.f32.mrb[20].mxu1  ;;  %v4991_v46 = vld [vmem:[#allocation6 + $0x290] sm:$0xff]  }
 0x2b4   :  { %4281 = vmatprep.subr.bf16.mxu0 %v4952_v49  ;;  %v1750_v55 = vpop.f32.mrb[21].mxu1  ;;  %v4995_v49 = vld [vmem:[#allocation6 + $0x258] sm:$0xff]   ;;  %v5000_v50 = vld [vmem:[#allocation6 + $0x2a8] sm:$0xff]  }
 0x2b5   :  { %v1752_v7 = vpop.f32.mrb[22].mxu1  ;;  %v5001_v55 = vld [vmem:[#allocation6 + $0x268] sm:$0xff]  }
 0x2b6   :  { %4504 = vmatpush3.bf16.msra.mxu1 %v4951_v53  ;;  %v1754_v31 = vpop.f32.mrb[23].mxu1  ;;  %v4996_v53 = vld [vmem:[#allocation6 + $0x458] sm:$0xff]   ;;  %v5003_v7 = vld [vmem:[#allocation6 + $0x2b0] sm:$0xff]  }
 0x2b7   :  { %4282 = vmatpush3.bf16.msra.mxu0 %v4953_v54  ;;  %4505 = vmatprep.subr.bf16.mxu1 %v5104_v62  ;;  %v4998_v54 = vld [vmem:[#allocation6 + $0x260] sm:$0xff]   ;;  %v5004_v31 = vld [vmem:[#allocation6 + $0x270] sm:$0xff]  }
 0x2b8   :  { %4283 = vmatprep.subr.bf16.mxu0 %v4955_v8  ;;  %v4999_v8 = vld [vmem:[#allocation6 + $0x460] sm:$0xff]  }
 0x2ba   :  { %4506 = vmatpush3.bf16.msra.mxu1 %v4954_v32  ;;  %v5002_v32 = vld [vmem:[#allocation6 + $0x468] sm:$0xff]  }
 0x2bb   :  { %4284 = vmatpush3.bf16.msra.mxu0 %v4956_v56  ;;  %4507 = vmatprep.subr.bf16.mxu1 %v5104_v62  ;;  %v5006_v56 = vld [vmem:[#allocation6 + $0x2b8] sm:$0xff]  }
 0x2bc   :  { %4285 = vmatprep.subr.bf16.mxu0 %v4958_v57  ;;  %v5005_v57 = vld [vmem:[#allocation6 + $0x470] sm:$0xff]  }
 0x2be   :  { %4508 = vmatpush3.bf16.msra.mxu1 %v4957_v58  ;;  %v5007_v58 = vld [vmem:[#allocation6 + $0x278] sm:$0xff]  }
 0x2bf   :  { %4286 = vmatpush3.bf16.msra.mxu0 %v4959_v59  ;;  %4509 = vmatprep.subr.bf16.mxu1 %v5104_v62  ;;  %v5009_v59 = vld [vmem:[#allocation6 + $0x340] sm:$0xff]  }
 0x2c0   :  { %4302 = vmatprep.subr.bf16.mxu0 %v4961_v2  ;;  %v5010_v2 = vld [vmem:[#allocation6 + $0x300] sm:$0xff]  }
 0x2c2   :  { %4510 = vmatpush3.bf16.msra.mxu1 %v4960_v4  ;;  %2494 = vmatmul.mubr.bf16.vlgmr.msra.gmra.mrb[68].mxu0 %v2266_v17  ;;  %v5011_v4 = vld [vmem:[#allocation6 + $0x348] sm:$0xff]   ;;  %v3388_v17 = vpack.c.bf16 %v5413_v48, %v5413_v48 }
 0x2c3   :  { %4303 = vmatpush3.bf16.msra.mxu0 %v4962_v6  ;;  %2773 = vmatprep.mubr.bf16.mxu0 %v2547_v11  ;;  %v3107_v6 = vpack.c.bf16 %v5466_v36, %v5466_v36  ;;  %v5013_v11 = vld [vmem:[#allocation6 + $0x350] sm:$0xff]   ;;  %v5018_v36 = vld [vmem:[#allocation6 + $0x320] sm:$0xff]   ;;  %v5020_v48 = vld [vmem:[#allocation6 + $0x328] sm:$0xff]  }
 0x2c4   :  { %4515 = vmatprep.subr.bf16.mxu1 %v5104_v62  ;;  %4304 = vmatprep.subr.bf16.mxu0 %v4964_v10  ;;  %v5012_v10 = vld [vmem:[#allocation6 + $0x308] sm:$0xff]  }
 0x2c5   :  { %4512 = vmatmul.mubr.bf16.vlgmr.msra.gmra.mrb[24].mxu1 %v2828_v60  ;;  %v5016_v60 = vld [vmem:[#allocation6 + $0x318] sm:$0xff]  }
 0x2c6   :  { %4516 = vmatpush3.bf16.msra.mxu1 %v4963_v16  ;;  %4531 = vmatprep.mubr.msk.bf16.mxu1 %vm5106_vm2, %v5104_v62  ;;  %v5014_v16 = vld [vmem:[#allocation6 + $0x310] sm:$0xff]  }
 0x2c7   :  { %4305 = vmatpush3.bf16.msra.mxu0 %v4965_v9  ;;  %4517 = vmatprep.subr.bf16.mxu1 %v5104_v62  ;;  %v5017_v9 = vld [vmem:[#allocation6 + $0x360] sm:$0xff]  }
 0x2c8   :  { %4306 = vmatprep.subr.bf16.mxu0 %v4967_v61  ;;  %v5019_v61 = vld [vmem:[#allocation6 + $0x368] sm:$0xff]  }
 0x2ca   :  { %4518 = vmatpush3.bf16.msra.mxu1 %v4966_v19  ;;  %v5021_v19 = vld [vmem:[#allocation6 + $0x370] sm:$0xff]  }
 0x2cb   :  { %4307 = vmatpush3.bf16.msra.mxu0 %v4968_v26  ;;  %4519 = vmatprep.subr.bf16.mxu1 %v5104_v62  ;;  %v5022_v26 = vld [vmem:[#allocation6 + $0x330] sm:$0xff]  }
 0x2cc   :  { %4308 = vmatprep.subr.bf16.mxu0 %v4970_v12  ;;  %v5023_v12 = vld [vmem:[#allocation6 + $0x378] sm:$0xff]  }
 0x2ce   :  { %4520 = vmatpush3.bf16.msra.mxu1 %v4969_v38  ;;  %v5024_v38 = vld [vmem:[#allocation6 + $0x338] sm:$0xff]  }
 0x2cf   :  { %4309 = vmatpush3.bf16.msra.mxu0 %v4971_v13  ;;  %4521 = vmatprep.subr.bf16.mxu1 %v5104_v62  ;;  %v5025_v13 = vld [vmem:[#allocation6 + $0x400] sm:$0xff]  }
 0x2d0   :  { %4310 = vmatprep.subr.bf16.mxu0 %v4973_v0  ;;  %v5026_v0 = vld [vmem:[#allocation6 + $0x3c0] sm:$0xff]  }
 0x2d2   :  { %4522 = vmatpush3.bf16.msra.mxu1 %v4972_v14  ;;  %v3106_v14 = vpack.c.bf16 %v5463_v35, %v5463_v35  ;;  %v5034_v35 = vld [vmem:[#allocation6 + $0x3e0] sm:$0xff]  }
 0x2d3   :  { %4311 = vmatpush3.bf16.msra.mxu0 %v4974_v15  ;;  %4523 = vmatprep.subr.bf16.mxu1 %v5104_v62  ;;  %v5027_v15 = vld [vmem:[#allocation6 + $0x408] sm:$0xff]  }
 0x2d4   :  { %4312 = vmatprep.subr.bf16.mxu0 %v4976_v18  ;;  %v3387_v18 = vpack.c.bf16 %v5472_v44, %v5472_v44  ;;  %v5036_v44 = vld [vmem:[#allocation6 + $0x3e8] sm:$0xff]  }
 0x2d6   :  { %4524 = vmatpush3.bf16.msra.mxu1 %v4975_v23  ;;  %v5028_v23 = vld [vmem:[#allocation6 + $0x3c8] sm:$0xff]  }
 0x2d7   :  { %4313 = vmatpush3.bf16.msra.mxu0 %v4977_v25  ;;  %4525 = vmatprep.subr.bf16.mxu1 %v5104_v62  ;;  %v5029_v25 = vld [vmem:[#allocation6 + $0x410] sm:$0xff]  }
 0x2d8   :  { %4314 = vmatprep.subr.bf16.mxu0 %v4979_v27  ;;  %v5030_v27 = vld [vmem:[#allocation6 + $0x3d0] sm:$0xff]  }
 0x2da   :  { %4526 = vmatpush3.bf16.msra.mxu1 %v4978_v5  ;;  %v5031_v5 = vld [vmem:[#allocation6 + $0x418] sm:$0xff]  }
 0x2db   :  { %4315 = vmatpush3.bf16.msra.mxu0 %v4980_v28  ;;  %4527 = vmatprep.subr.bf16.mxu1 %v5104_v62  ;;  %v5032_v28 = vld [vmem:[#allocation6 + $0x3d8] sm:$0xff]  }
 0x2dc   :  { %4316 = vmatprep.subr.bf16.mxu0 %v4982_v20  ;;  %v5033_v20 = vld [vmem:[#allocation6 + $0x420] sm:$0xff]  }
 0x2de   :  { %4528 = vmatpush3.bf16.msra.mxu1 %v4981_v63  ;;  %v5035_v63 = vld [vmem:[#allocation6 + $0x428] sm:$0xff]  }
 0x2df   :  { %4317 = vmatpush3.bf16.msra.mxu0 %v4983_v29  ;;  %4529 = vmatprep.subr.bf16.mxu1 %v5104_v62  ;;  %v5037_v29 = vld [vmem:[#allocation6 + $0x430] sm:$0xff]  }
 0x2e0   :  { %4333 = vmatprep.subr.bf16.mxu0 %v4985_v33  ;;  %v5038_v33 = vld [vmem:[#allocation6 + $0x3f0] sm:$0xff]  }
 0x2e2   :  { %4530 = vmatpush3.bf16.msra.mxu1 %v4984_v34  ;;  %2774 = vmatmul.mubr.bf16.vlgmr.msra.gmra.mrb[72].mxu0 %v2546_v22  ;;  %v5039_v34 = vld [vmem:[#allocation6 + $0x438] sm:$0xff]   ;;  %v3386_v22 = vpack.c.bf16 %v5469_v40, %v5469_v40  ;;  %v5042_v40 = vld [vmem:[%s5573_s7 + $0x8] sm:$0xff]  }
 0x2e3   :  { %4334 = vmatpush3.bf16.msra.mxu0 %v4986_v24  ;;  %3053 = vmatprep.mubr.bf16.mxu0 %v2827_v39  ;;  %v5040_v24 = vld [vmem:[#allocation6 + $0x3f8] sm:$0xff]  }
 0x2e4   :  { %4535 = vmatprep.subr.bf16.mxu1 %v5104_v62  ;;  %4335 = vmatprep.subr.bf16.mxu0 %v4988_v37 }
 0x2e5   :  { %4532 = vmatmul.mubr.bf16.vlgmr.msra.gmra.mrb[24].mxu1 %v3108_v51 }
 0x2e6   :  { %4536 = vmatpush3.bf16.msra.mxu1 %v4987_v41  ;;  %4551 = vmatprep.mubr.msk.bf16.mxu1 %vm5106_vm2, %v5104_v62 }
 0x2e7   :  { %4336 = vmatpush3.bf16.msra.mxu0 %v4989_v42  ;;  %4537 = vmatprep.subr.bf16.mxu1 %v5104_v62 }
 0x2e8   :  { %4337 = vmatprep.subr.bf16.mxu0 %v4991_v46  ;;  %v5041_v46 = vld [vmem:[%s5573_s7] sm:$0xff]  }
 0x2ea   :  { %4538 = vmatpush3.bf16.msra.mxu1 %v4990_v21  ;;  %v5043_v21 = vld [vmem:[%s5573_s7 + $0x10] sm:$0xff]  }
 0x2eb   :  { %4338 = vmatpush3.bf16.msra.mxu0 %v4992_v30  ;;  %4539 = vmatprep.subr.bf16.mxu1 %v5104_v62  ;;  %v5044_v30 = vld [vmem:[%s5573_s7 + $0x18] sm:$0xff]  }
 0x2ec   :  { %4339 = vmatprep.subr.bf16.mxu0 %v4994_v47  ;;  %v5045_v47 = vld [vmem:[%s5573_s7 + $0x20] sm:$0xff]  }
 0x2ee   :  { %4540 = vmatpush3.bf16.msra.mxu1 %v4993_v45  ;;  %v5046_v45 = vld [vmem:[%s5573_s7 + $0x28] sm:$0xff]  }
 0x2ef   :  { %4340 = vmatpush3.bf16.msra.mxu0 %v4995_v49  ;;  %4541 = vmatprep.subr.bf16.mxu1 %v5104_v62  ;;  %v3990_v49 = vld [vmem:[%s5572_s6] ss:$0 sm:$0xff] }
 0x2f0   :  { %4341 = vmatprep.subr.bf16.mxu0 %v4997_v52 }
 0x2f2   :  { %4542 = vmatpush3.bf16.msra.mxu1 %v4996_v53 }
 0x2f3   :  { %4342 = vmatpush3.bf16.msra.mxu0 %v4998_v54  ;;  %4543 = vmatprep.subr.bf16.mxu1 %v5104_v62 }
 0x2f4   :  { %4343 = vmatprep.subr.bf16.mxu0 %v5000_v50 }
 0x2f6   :  { %4544 = vmatpush3.bf16.msra.mxu1 %v4999_v8 }
 0x2f7   :  { %4344 = vmatpush3.bf16.msra.mxu0 %v5001_v55  ;;  %4545 = vmatprep.subr.bf16.mxu1 %v5104_v62  ;;  %v5047_v55 = vld [vmem:[%s5573_s7 + $0x30] sm:$0xff]  }
 0x2f8   :  { %4345 = vmatprep.subr.bf16.mxu0 %v5003_v7 }
 0x2fa   :  { %4546 = vmatpush3.bf16.msra.mxu1 %v5002_v32 }
 0x2fb   :  { %4346 = vmatpush3.bf16.msra.mxu0 %v5004_v31  ;;  %4547 = vmatprep.subr.bf16.mxu1 %v5104_v62  ;;  %v5048_v31 = vld [vmem:[%s5573_s7 + $0x38] sm:$0xff]  }
 0x2fc   :  { %4347 = vmatprep.subr.bf16.mxu0 %v5006_v56 }
 0x2fe   :  { %4548 = vmatpush3.bf16.msra.mxu1 %v5005_v57 }
 0x2ff   :  { %4348 = vmatpush3.bf16.msra.mxu0 %v5007_v58  ;;  %4549 = vmatprep.subr.bf16.mxu1 %v5104_v62 }
 0x300   :  { %4364 = vmatprep.subr.bf16.mxu0 %v5009_v59 }
 0x302   :  { %4550 = vmatpush3.bf16.msra.mxu1 %v5008_v1  ;;  %3054 = vmatmul.mubr.bf16.vlgmr.msra.gmra.mrb[76].mxu0 %v2826_v3 }
 0x303   :  { %4365 = vmatpush3.bf16.msra.mxu0 %v5010_v2  ;;  %3333 = vmatprep.mubr.bf16.mxu0 %v3107_v6 }
 0x304   :  { %4366 = vmatprep.subr.bf16.mxu0 %v5011_v4 }
 0x305   :  { %4552 = vmatmul.mubr.bf16.vlgmr.msra.gmra.mrb[24].mxu1 %v3388_v17 }
 0x307   :  { %4367 = vmatpush3.bf16.msra.mxu0 %v5012_v10 }
 0x308   :  { %4368 = vmatprep.subr.bf16.mxu0 %v5013_v11 }
 0x30b   :  { %4369 = vmatpush3.bf16.msra.mxu0 %v5014_v16 }
 0x30c   :  { %4370 = vmatprep.subr.bf16.mxu0 %v5015_v43 }
 0x30f   :  { %4371 = vmatpush3.bf16.msra.mxu0 %v5016_v60 }
 0x310   :  { %4372 = vmatprep.subr.bf16.mxu0 %v5017_v9 }
 0x313   :  { %4373 = vmatpush3.bf16.msra.mxu0 %v5018_v36 }
 0x314   :  { %4374 = vmatprep.subr.bf16.mxu0 %v5019_v61 }
 0x317   :  { %4375 = vmatpush3.bf16.msra.mxu0 %v5020_v48 }
 0x318   :  { %4376 = vmatprep.subr.bf16.mxu0 %v5021_v19 }
 0x31b   :  { %4377 = vmatpush3.bf16.msra.mxu0 %v5022_v26 }
 0x31c   :  { %4378 = vmatprep.subr.bf16.mxu0 %v5023_v12 }
 0x31f   :  { %4379 = vmatpush3.bf16.msra.mxu0 %v5024_v38 }
 0x320   :  { %4395 = vmatprep.subr.bf16.mxu0 %v5025_v13 }
 0x322   :  { %3334 = vmatmul.mubr.bf16.vlgmr.msra.gmra.mrb[80].mxu0 %v3106_v14 }
 0x323   :  { %4396 = vmatpush3.bf16.msra.mxu0 %v5026_v0  ;;  %3613 = vmatprep.mubr.bf16.mxu0 %v3387_v18 }
 0x324   :  { %4397 = vmatprep.subr.bf16.mxu0 %v5027_v15 }
 0x327   :  { %4398 = vmatpush3.bf16.msra.mxu0 %v5028_v23 }
 0x328   :  { %4399 = vmatprep.subr.bf16.mxu0 %v5029_v25  ;;  %v4111_v25 = vld [vmem:[%s5574_s8] ss:$0 sm:$0xff] }
 0x32b   :  { %4400 = vmatpush3.bf16.msra.mxu0 %v5030_v27 }
 0x32c   :  { %4401 = vmatprep.subr.bf16.mxu0 %v5031_v5 }
 0x32f   :  { %4402 = vmatpush3.bf16.msra.mxu0 %v5032_v28 }
 0x330   :  { %4403 = vmatprep.subr.bf16.mxu0 %v5033_v20 }
 0x333   :  { %4404 = vmatpush3.bf16.msra.mxu0 %v5034_v35 }
 0x334   :  { %4405 = vmatprep.subr.bf16.mxu0 %v5035_v63 }
 0x337   :  { %4406 = vmatpush3.bf16.msra.mxu0 %v5036_v44 }
 0x338   :  { %4407 = vmatprep.subr.bf16.mxu0 %v5037_v29 }
 0x33b   :  { %4408 = vmatpush3.bf16.msra.mxu0 %v5038_v33 }
 0x33c   :  { %4409 = vmatprep.subr.bf16.mxu0 %v5039_v34 }
 0x33f   :  { %4410 = vmatpush3.bf16.msra.mxu0 %v5040_v24 }
 0x340   :  { %4555 = vmatprep.subr.bf16.mxu0 %v5104_v62 }
 0x342   :  { %3614 = vmatmul.mubr.bf16.vlgmr.msra.gmra.mrb[84].mxu0 %v3386_v22 }
 0x343   :  { %4571 = vmatprep.mubr.msk.bf16.mxu0 %vm5106_vm2, %v5104_v62  ;;  %4556 = vmatpush3.bf16.msra.mxu0 %v5041_v46 }
 0x344   :  { %4557 = vmatprep.subr.bf16.mxu0 %v5104_v62 }
 0x347   :  { %4558 = vmatpush3.bf16.msra.mxu0 %v5042_v40 }
 0x348   :  { %4559 = vmatprep.subr.bf16.mxu0 %v5104_v62 }
 0x34b   :  { %4560 = vmatpush3.bf16.msra.mxu0 %v5043_v21 }
 0x34c   :  { %4561 = vmatprep.subr.bf16.mxu0 %v5104_v62 }
 0x34f   :  { %4562 = vmatpush3.bf16.msra.mxu0 %v5044_v30 }
 0x350   :  { %4563 = vmatprep.subr.bf16.mxu0 %v5104_v62 }
 0x353   :  { %4564 = vmatpush3.bf16.msra.mxu0 %v5045_v47 }
 0x354   :  { %4565 = vmatprep.subr.bf16.mxu0 %v5104_v62 }
 0x357   :  { %4566 = vmatpush3.bf16.msra.mxu0 %v5046_v45 }
 0x358   :  { %4567 = vmatprep.subr.bf16.mxu0 %v5104_v62 }
 0x35b   :  { %4568 = vmatpush3.bf16.msra.mxu0 %v5047_v55 }
 0x35c   :  { %4569 = vmatprep.subr.bf16.mxu0 %v5104_v62 }
 0x35f   :  { %4570 = vmatpush3.bf16.msra.mxu0 %v5048_v31 }
 0x375   :  { %v4256_v37 = vpop.f32.mrb[64].mxu0 }
 0x376   :  { %v4257_v39 = vpop.f32.mrb[65].mxu0 }
 0x377   :  { %v4258_v41 = vadd.f32 %v4257_v39, %v4256_v37  ;;  %v4259_v51 = vpop.f32.mrb[66].mxu0 }
 0x378   :  { %v4260_v42 = vpop.f32.mrb[67].mxu0 }
 0x379   :  { %v4603_v54 = vadd.f32 %v4258_v41, %v3990_v49 }
 0x395   :  { %v4287_v52 = vpop.f32.mrb[68].mxu0 }
 0x396   :  { %v4288_v53 = vpop.f32.mrb[69].mxu0 }
 0x397   :  { %v4289_v50 = vadd.f32 %v4288_v53, %v4287_v52  ;;  %v4290_v8 = vpop.f32.mrb[70].mxu0 }
 0x398   :  { %v4291_v7 = vpop.f32.mrb[71].mxu0 }
 0x399   :  { %v4604_v32 = vadd.f32 %v4603_v54, %v4289_v50 }
 0x3b5   :  { %v4318_v56 = vpop.f32.mrb[72].mxu0 }
 0x3b6   :  { %v4319_v57 = vpop.f32.mrb[73].mxu0 }
 0x3b7   :  { %v4320_v58 = vadd.f32 %v4319_v57, %v4318_v56  ;;  %v4321_v59 = vpop.f32.mrb[74].mxu0 }
 0x3b8   :  { %v4322_v1 = vpop.f32.mrb[75].mxu0 }
 0x3b9   :  { %v4605_v2 = vadd.f32 %v4604_v32, %v4320_v58 }
 0x3d5   :  { %v4349_v3 = vpop.f32.mrb[76].mxu0 }
 0x3d6   :  { %v4350_v4 = vpop.f32.mrb[77].mxu0 }
 0x3d7   :  { %v4351_v6 = vadd.f32 %v4350_v4, %v4349_v3  ;;  %v4352_v17 = vpop.f32.mrb[78].mxu0 }
 0x3d8   :  { %v3655_v10 = vpop.f32.mrb[24].mxu1  ;;  %v4353_v11 = vpop.f32.mrb[79].mxu0 }
 0x3d9   :  { %v4606_v16 = vadd.f32 %v4605_v2, %v4351_v6  ;;  %v4553_v43 = vpop.f32.mrb[25].mxu1 }
 0x3da   :  { %v3658_v62 = vpop.f32.mrb[26].mxu1 }
 0x3db   :  { %v4554_v60 = vpop.f32.mrb[27].mxu1 }
 0x3f5   :  { %v4380_v9 = vpop.f32.mrb[80].mxu0 }
 0x3f6   :  { %v4381_v36 = vpop.f32.mrb[81].mxu0 }
 0x3f7   :  { %v4382_v61 = vadd.f32 %v4381_v36, %v4380_v9  ;;  %v4383_v48 = vpop.f32.mrb[82].mxu0 }
 0x3f8   :  { %v4384_v19 = vpop.f32.mrb[83].mxu0 }
 0x3f9   :  { %v4607_v26 = vadd.f32 %v4606_v16, %v4382_v61 }
 0x415   :  { %v4411_v12 = vpop.f32.mrb[84].mxu0 }
 0x416   :  { %v4412_v38 = vpop.f32.mrb[85].mxu0 }
 0x417   :  { %v4413_v13 = vadd.f32 %v4412_v38, %v4411_v12  ;;  %v4414_v0 = vpop.f32.mrb[86].mxu0 }
 0x418   :  { %v4415_v14 = vpop.f32.mrb[87].mxu0 }
 0x419   :  { %v4608_v15 = vadd.f32 %v4607_v26, %v4413_v13 }
 0x41b   :  { %v4609_v18 = vadd.f32 %v4608_v15, %v3655_v10 }
 0x41d   :  { %v3662_v23 = vpack.c.bf16 %v4609_v18, %v4609_v18 }
 0x41f   :  { %4572 = vmatmul.mubr.bf16.vlgmr.msra.gmra.mrb[88].mxu0 %v3662_v23 }
 0x4f2   :  { %v3768_v27 = vpop.f32.mrb[88].mxu0 }
 0x4f3   :  { %v3769_v5 = vadd.f32 %v4111_v25, %v3768_v27  ;;  %v4573_v28 = vpop.f32.mrb[89].mxu0 }
 0x4f4   :  { %v3771_v20 = vpop.f32.mrb[90].mxu0 }
 0x4f5   :  { %3774 = vst [vmem:[%s5575_s9] sm:$0xff] %v3769_v5  ;;  %v4574_v35 = vpop.f32.mrb[91].mxu0 }
 0x4f6   :  { %3779 = vsyncpa [#allocation5], 1 }
 0x4f7   :  { %3780 = vsyncpa [#allocation7], 1 }

</bundles_post_ra>
